<compile_context>
chip_gen: v7x
topology: tpu7x:2x2x1
jax: 0.10.0
libtpu: 0.0.40
codegen_flags: <defaults>
</compile_context>

<pallas_src>
import math
import functools

import numpy as np
import jax
import jax.numpy as jnp
from jax import lax
from jax.experimental import pallas as pl
from jax.experimental.pallas import tpu as pltpu

# ---------------- problem sizes (small, consistent with the module) ----------
B = 2            # batch
S = 8            # sequence length (power of two -> batch-id via shift)
STATE_DIM = 30   # state_dim
NUM_HEADS = 4
E = (STATE_DIM // NUM_HEADS + 1) * NUM_HEADS if STATE_DIM % NUM_HEADS else STATE_DIM
HD = E // NUM_HEADS          # head dim
HIDDEN = 64                  # hidden_size (small stand-in for 512)
L = 2                        # num_layers
A = 4                        # action_dim
LN_EPS = 1e-5
NEG_INF = -1e30
SLAB_W = 128                 # lane-dense slab width
BS = B * S
XPAD = ((STATE_DIM + 15) // 16) * 16      # zero-padded embed contraction dim (32)
DYN_ROWS = ((BS + 1 + 7) // 8) * 8        # fused dynamic input rows (24)
OUT_ROWS = 8                              # lane-dense output sublane rows
assert S & (S - 1) == 0
SHIFT_S = S.bit_length() - 1              # log2(S)


# ---------------- parameter slab layouts (static, shapes only) ---------------
def _w_layout():
    """bf16 matmul-weight slab; 16-row (packed-tile) aligned entry starts."""
    entries = [("emb_wT", XPAD, E)]
    for l in range(L):
        p = f"l{l}_"
        entries += [(p + "inproj_wT", E, 3 * E), (p + "outproj_w", E, E),
                    (p + "ff1_wT", E, HIDDEN), (p + "ff2_wT", HIDDEN, E)]
    entries += [("mlp1_wT", E, HIDDEN), ("mlp2_wT", HIDDEN, HIDDEN),
                ("head_wT", HIDDEN, 2 * A)]
    index, row = {}, 0
    for name, nr, nc in entries:
        index[name] = (row, nr, nc)
        row += ((nr + 15) // 16) * 16
    return index, row


def _b_layout():
    """f32 bias / LayerNorm / pos-enc slab; rows packed consecutively."""
    entries = [("emb_pos_b", BS, E)]
    for l in range(L):
        p = f"l{l}_"
        entries += [(p + "inproj_b", 1, 3 * E), (p + "outproj_b", 1, E),
                    (p + "ln1_w", 1, E), (p + "ln1_b", 1, E),
                    (p + "ff1_b", 1, HIDDEN), (p + "ff2_b", 1, E),
                    (p + "ln2_w", 1, E), (p + "ln2_b", 1, E)]
    entries += [("mlp1_b", 1, HIDDEN), ("mlp2_b", 1, HIDDEN), ("head_b", 1, 2 * A)]
    index, row = {}, 0
    for name, nr, nc in entries:
        index[name] = (row, nr, nc)
        row += nr
    return index, ((row + 7) // 8) * 8


W_INDEX, W_ROWS = _w_layout()
B_INDEX, B_ROWS = _b_layout()


# ---------------- shared math helpers (kernel and reference) -----------------
def _layer_norm(x, w, b, eps=LN_EPS):
    mu = jnp.mean(x, axis=-1, keepdims=True)
    var = jnp.mean(jnp.square(x - mu), axis=-1, keepdims=True)
    return (x - mu) * jax.lax.rsqrt(var + eps) * w + b


def pos_encoding(seq_len, embed_dim):
    pos = jnp.arange(seq_len, dtype=jnp.float32)[:, None]
    div_term = jnp.exp(
        jnp.arange(0, embed_dim, 2, dtype=jnp.float32) * (-math.log(10000.0) / embed_dim)
    )
    ang = pos * div_term
    enc = jnp.zeros((seq_len, embed_dim), jnp.float32)
    enc = enc.at[:, 0::2].set(jnp.sin(ang))
    enc = enc.at[:, 1::2].set(jnp.cos(ang))
    return enc


# ---------------- the Pallas kernel ------------------------------------------
def actor_kernel(dyn_ref, wslab_ref, bslab_ref, out_ref):
    def get_w(name, nc=None):
        r0, nr, enc = W_INDEX[name]
        return wslab_ref[r0:r0 + nr, 0:(enc if nc is None else nc)]

    def get_b(name, nc=None):
        r0, nr, enc = B_INDEX[name]
        return bslab_ref[r0:r0 + nr, 0:(enc if nc is None else nc)]

    def bf(x):
        return x if x.dtype == jnp.bfloat16 else x.astype(jnp.bfloat16)

    def mm(a, b):      # (M,K) @ (K,N) -> f32; bf16 MXU operands, f32 accumulation
        return jnp.dot(bf(a), bf(b), preferred_element_type=jnp.float32)

    def mm_nt(a, b):   # contract last dims: (M,K),(N,K) -> (M,N), no explicit .T
        return lax.dot_general(bf(a), bf(b), (((1,), (1,)), ((), ())),
                               preferred_element_type=jnp.float32)

    x = dyn_ref[0:BS, 0:XPAD]             # (BS, 32): state, zero-padded lanes
    mflat = dyn_ref[BS:BS + 1, 0:BS]      # (1, BS): 1.0 = padded key token

    # ---- attention bias: block-diagonal same-batch + key padding (f32) ------
    key_bias = jnp.where(mflat > 0.5, NEG_INF, 0.0)                     # (1, BS)
    row_b = jnp.right_shift(lax.broadcasted_iota(jnp.int32, (BS, BS), 0), SHIFT_S)
    col_b = jnp.right_shift(lax.broadcasted_iota(jnp.int32, (BS, BS), 1), SHIFT_S)
    attn_bias = jnp.where(row_b == col_b,
                          jnp.broadcast_to(key_bias, (BS, BS)), NEG_INF)

    # ---- masked-mean pooling weights (8 sublane rows; rows >= B are zero) ----
    valid = jnp.broadcast_to(1.0 - mflat, (OUT_ROWS, BS))
    prow = lax.broadcasted_iota(jnp.int32, (OUT_ROWS, BS), 0)
    pcol_b = jnp.right_shift(lax.broadcasted_iota(jnp.int32, (OUT_ROWS, BS), 1), SHIFT_S)
    pw = jnp.where(prow == pcol_b, valid, 0.0)                          # (8, BS)
    denom = jnp.sum(pw, axis=-1, keepdims=True) + 1e-6
    pool_w = pw * pl.reciprocal(denom, approx=True)                     # (8, BS) f32

    # ---- embedding (+ bias + positional encoding folded into emb_pos_b) ------
    h = mm(x, get_w("emb_wT")) + get_b("emb_pos_b")                     # (BS, E)

    # ---- transformer encoder (post-LN, relu FFN, eval-mode dropout) ----------
    for l in range(L):
        p = f"l{l}_"
        # q columns of in_proj already carry 1/sqrt(HD) (host-folded)
        qkv = mm(h, get_w(p + "inproj_wT")) + get_b(p + "inproj_b")     # (BS, 3E)
        wo_r0 = W_INDEX[p + "outproj_w"][0]
        acc = None
        for hh in range(NUM_HEADS):
            lo = hh * HD
            q = qkv[:, lo:lo + HD]
            k = qkv[:, E + lo:E + lo + HD]
            v = qkv[:, 2 * E + lo:2 * E + lo + HD]
            s = mm_nt(q, k) + attn_bias                                 # (BS, BS)
            s = s - jnp.max(s, axis=-1, keepdims=True)
            e = jnp.exp(s)
            prob = e * pl.reciprocal(jnp.sum(e, axis=-1, keepdims=True), approx=True)
            pv = mm(prob, v)                                            # (BS, HD)
            # distribute out-projection over heads: lane-slice of W_o (E_out, E_in)
            w_h = wslab_ref[wo_r0:wo_r0 + E, lo:lo + HD]                # (E, HD) bf16
            t = mm_nt(pv, w_h)                                          # (BS, E)
            acc = t if acc is None else acc + t
        attn = acc + get_b(p + "outproj_b")
        h = _layer_norm(h + attn, get_b(p + "ln1_w"), get_b(p + "ln1_b"))

        ff = jnp.maximum(mm(h, get_w(p + "ff1_wT")) + get_b(p + "ff1_b"), 0.0)
        ff = mm(ff, get_w(p + "ff2_wT")) + get_b(p + "ff2_b")
        h = _layer_norm(h + ff, get_b(p + "ln2_w"), get_b(p + "ln2_b"))

    # ---- masked mean pooling: one tiny f32 matmul (exact pooling weights) ----
    pooled = jnp.dot(pool_w, h, preferred_element_type=jnp.float32)     # (8, E)

    # ---- MLP + fused mu/sigma head, lane-dense (8,128) output ----------------
    m = jnp.maximum(mm(pooled, get_w("mlp1_wT")) + get_b("mlp1_b"), 0.0)
    m = jnp.maximum(mm(m, get_w("mlp2_wT")) + get_b("mlp2_b"), 0.0)
    head = mm(m, get_w("head_wT", nc=SLAB_W)) + get_b("head_b", nc=SLAB_W)  # (8,128)

    # softplus (threshold 20, like PyTorch) + 1e-6 on the sigma half
    sp = jnp.where(head > 20.0, head,
                   jnp.log(1.0 + jnp.exp(jnp.minimum(head, 20.0)))) + 1e-6
    col = lax.broadcasted_iota(jnp.int32, (OUT_ROWS, SLAB_W), 1)
    out_ref[...] = jnp.where(col < A, head, sp)


# ---------------- host-side parameter packing (done once) ---------------------
def pack_params(params):
    wslab = jnp.zeros((W_ROWS, SLAB_W), jnp.float32)
    bslab = jnp.zeros((B_ROWS, SLAB_W), jnp.float32)

    def put(slab, index, name, arr):
        r0, nr, nc = index[name]
        arr = jnp.asarray(arr, jnp.float32).reshape(nr, nc)
        return slab.at[r0:r0 + nr, 0:nc].set(arr)

    scale = 1.0 / math.sqrt(HD)
    qscale = jnp.concatenate(
        [jnp.full((1, E), scale, jnp.float32), jnp.ones((1, 2 * E), jnp.float32)],
        axis=1)
    pos_tiled = jnp.tile(pos_encoding(S, E), (B, 1))

    emb_wT = jnp.zeros((XPAD, E), jnp.float32).at[0:STATE_DIM, :].set(params["emb_w"].T)
    wslab = put(wslab, W_INDEX, "emb_wT", emb_wT)
    bslab = put(bslab, B_INDEX, "emb_pos_b", pos_tiled + params["emb_b"])
    for l in range(L):
        p = f"l{l}_"
        wslab = put(wslab, W_INDEX, p + "inproj_wT", params["inproj_w"][l].T * qscale)
        wslab = put(wslab, W_INDEX, p + "outproj_w", params["outproj_w"][l])  # (out,in)
        wslab = put(wslab, W_INDEX, p + "ff1_wT", params["ff1_w"][l].T)
        wslab = put(wslab, W_INDEX, p + "ff2_wT", params["ff2_w"][l].T)
        bslab = put(bslab, B_INDEX, p + "inproj_b", params["inproj_b"][l] * qscale)
        bslab = put(bslab, B_INDEX, p + "outproj_b", params["outproj_b"][l])
        bslab = put(bslab, B_INDEX, p + "ln1_w", params["ln1_w"][l])
        bslab = put(bslab, B_INDEX, p + "ln1_b", params["ln1_b"][l])
        bslab = put(bslab, B_INDEX, p + "ff1_b", params["ff1_b"][l])
        bslab = put(bslab, B_INDEX, p + "ff2_b", params["ff2_b"][l])
        bslab = put(bslab, B_INDEX, p + "ln2_w", params["ln2_w"][l])
        bslab = put(bslab, B_INDEX, p + "ln2_b", params["ln2_b"][l])
    wslab = put(wslab, W_INDEX, "mlp1_wT", params["mlp1_w"].T)
    wslab = put(wslab, W_INDEX, "mlp2_wT", params["mlp2_w"].T)
    wslab = put(wslab, W_INDEX, "head_wT",
                jnp.concatenate([params["mu_w"].T, params["sig_w"].T], axis=1))
    bslab = put(bslab, B_INDEX, "mlp1_b", params["mlp1_b"])
    bslab = put(bslab, B_INDEX, "mlp2_b", params["mlp2_b"])
    bslab = put(bslab, B_INDEX, "head_b",
                jnp.concatenate([params["mu_b"], params["sig_b"]], axis=1))
    return wslab.astype(jnp.bfloat16), bslab


# ---------------- wrapper ------------------------------------------------------
@jax.jit
def actor_forward(wslab, bslab, state_seq, mask_bool):
    # fused dynamic input: padded state rows + one flattened key-padding row
    dyn = jnp.zeros((DYN_ROWS, SLAB_W), jnp.float32)
    dyn = dyn.at[0:BS, 0:STATE_DIM].set(
        state_seq.reshape(BS, STATE_DIM).astype(jnp.float32))
    dyn = dyn.at[BS, 0:BS].set(mask_bool.reshape(BS).astype(jnp.float32))

    vmem = functools.partial(pl.BlockSpec, memory_space=pltpu.MemorySpace.VMEM)
    out = pl.pallas_call(
        actor_kernel,
        out_shape=jax.ShapeDtypeStruct((OUT_ROWS, SLAB_W), jnp.float32),
        in_specs=[vmem(), vmem(), vmem()],
        out_specs=vmem(),
    )(dyn, wslab, bslab)
    return out[0:B, 0:A], out[0:B, A:2 * A]


# ---------------- deterministic parameter init --------------------------------
def init_params(key):
    keys = iter(jax.random.split(key, 64))

    def rnd(shape, scale):
        return jax.random.normal(next(keys), shape, jnp.float32) * scale

    def lin_w(out_d, in_d, gain=1.0):
        return rnd((out_d, in_d), gain / np.sqrt(in_d))

    def lin_b(out_d):
        return rnd((1, out_d), 0.01)

    def stack(fn):
        return jnp.stack([fn() for _ in range(L)], axis=0)

    p = {}
    p["emb_w"], p["emb_b"] = lin_w(E, STATE_DIM), lin_b(E)
    p["inproj_w"] = stack(lambda: lin_w(3 * E, E))
    p["inproj_b"] = stack(lambda: lin_b(3 * E))          # (L, 1, 3E)
    p["outproj_w"] = stack(lambda: lin_w(E, E))
    p["outproj_b"] = stack(lambda: lin_b(E))
    p["ln1_w"] = jnp.ones((L, 1, E), jnp.float32)
    p["ln1_b"] = jnp.zeros((L, 1, E), jnp.float32)
    p["ln2_w"] = jnp.ones((L, 1, E), jnp.float32)
    p["ln2_b"] = jnp.zeros((L, 1, E), jnp.float32)
    p["ff1_w"] = stack(lambda: lin_w(HIDDEN, E))
    p["ff1_b"] = stack(lambda: lin_b(HIDDEN))
    p["ff2_w"] = stack(lambda: lin_w(E, HIDDEN))
    p["ff2_b"] = stack(lambda: lin_b(E))
    p["mlp1_w"], p["mlp1_b"] = lin_w(HIDDEN, E), lin_b(HIDDEN)
    p["mlp2_w"], p["mlp2_b"] = lin_w(HIDDEN, HIDDEN), lin_b(HIDDEN)
    p["mu_w"], p["mu_b"] = lin_w(A, HIDDEN, gain=0.01), lin_b(A)
    p["sig_w"], p["sig_b"] = lin_w(A, HIDDEN, gain=0.01), lin_b(A)
    return p


# ---------------- pure-JAX reference (mirrors the PyTorch forward) ------------
def reference_forward(p, state_seq, mask_bool):
    mask_f = mask_bool.astype(jnp.float32)
    h = state_seq @ p["emb_w"].T + p["emb_b"][0]                    # (B,S,E)
    h = h + pos_encoding(S, E)[None]
    neg = jnp.where(mask_bool, NEG_INF, 0.0)                        # (B,S)

    for l in range(L):
        qkv = h @ p["inproj_w"][l].T + p["inproj_b"][l, 0]
        q, k, v = jnp.split(qkv, 3, axis=-1)

        def heads(t):
            return t.reshape(B, S, NUM_HEADS, HD).transpose(0, 2, 1, 3)

        qh, kh, vh = heads(q), heads(k), heads(v)
        scores = jnp.einsum("bhqd,bhkd->bhqk", qh, kh) / math.sqrt(HD)
        scores = scores + neg[:, None, None, :]
        attn = jax.nn.softmax(scores, axis=-1)
        o = jnp.einsum("bhqk,bhkd->bhqd", attn, vh)
        o = o.transpose(0, 2, 1, 3).reshape(B, S, E)
        o = o @ p["outproj_w"][l].T + p["outproj_b"][l, 0]
        h = _layer_norm(h + o, p["ln1_w"][l, 0], p["ln1_b"][l, 0])
        ff = jax.nn.relu(h @ p["ff1_w"][l].T + p["ff1_b"][l, 0])
        ff = ff @ p["ff2_w"][l].T + p["ff2_b"][l, 0]
        h = _layer_norm(h + ff, p["ln2_w"][l, 0], p["ln2_b"][l, 0])

    valid = 1.0 - mask_f
    pooled = (h * valid[..., None]).sum(1) / (valid.sum(1, keepdims=True) + 1e-6)
    m = jax.nn.relu(pooled @ p["mlp1_w"].T + p["mlp1_b"][0])
    m = jax.nn.relu(m @ p["mlp2_w"].T + p["mlp2_b"][0])
    mu = m @ p["mu_w"].T + p["mu_b"][0]
    sigma = jax.nn.softplus(m @ p["sig_w"].T + p["sig_b"][0]) + 1e-6
    return mu, sigma


# ---------------- main ---------------------------------------------------------
if __name__ == "__main__":
    key = jax.random.PRNGKey(0)
    pkey, xkey = jax.random.split(key)
    params = init_params(pkey)
    wslab, bslab = pack_params(params)        # packed once, reused every call

    state_seq = jax.random.normal(xkey, (B, S, STATE_DIM), jnp.float32)
    lengths = jnp.array([S, 5])
    mask_bool = jnp.arange(S)[None, :] >= lengths[:, None]   # True = padded token

    mu, sigma = actor_forward(wslab, bslab, state_seq, mask_bool)
    jax.block_until_ready((mu, sigma))

    mu_ref, sigma_ref = reference_forward(params, state_seq, mask_bool)
    assert mu.shape == (B, A) and sigma.shape == (B, A)
    assert np.all(np.isfinite(np.asarray(mu))) and np.all(np.isfinite(np.asarray(sigma)))
    # bf16 MXU operands + approx reciprocal bound agreement to ~1e-2 relative.
    np.testing.assert_allclose(np.asarray(mu), np.asarray(mu_ref), rtol=2e-2, atol=2e-2)
    np.testing.assert_allclose(np.asarray(sigma), np.asarray(sigma_ref), rtol=2e-2, atol=2e-2)

    print("KERNEL_OK")
</pallas_src>

<mosaic_0001>
module attributes {stable_mosaic.version = 11 : i64} {
  func.func @actor_kernel(%arg0: memref<24x128xf32, #tpu.memory_space<vmem>>, %arg1: memref<512x128xbf16, #tpu.memory_space<vmem>>, %arg2: memref<40x128xf32, #tpu.memory_space<vmem>>, %arg3: memref<8x128xf32, #tpu.memory_space<vmem>>) attributes {dimension_semantics = [], scalar_prefetch = 0 : i64, scratch_operands = 0 : i64, tpu.core_type = #tpu.core_type<tc>} {
    %c0 = arith.constant 0 : index
    %c0_0 = arith.constant 0 : index
    %0 = vector.load %arg0[%c0, %c0_0] : memref<24x128xf32, #tpu.memory_space<vmem>>, vector<16x32xf32>
    %c16 = arith.constant 16 : index
    %c0_1 = arith.constant 0 : index
    %1 = vector.load %arg0[%c16, %c0_1] : memref<24x128xf32, #tpu.memory_space<vmem>>, vector<1x16xf32>
    %cst = arith.constant 5.000000e-01 : f32
    %2 = vector.broadcast %cst : f32 to vector<1x16xf32>
    %3 = arith.cmpf ogt, %1, %2 : vector<1x16xf32>
    %cst_2 = arith.constant -1.000000e+30 : f32
    %cst_3 = arith.constant 0.000000e+00 : f32
    %4 = vector.broadcast %cst_2 : f32 to vector<1x16xf32>
    %5 = vector.broadcast %cst_3 : f32 to vector<1x16xf32>
    %6 = arith.select %3, %4, %5 : vector<1x16xi1>, vector<1x16xf32>
    %7 = tpu.iota {dimensions = array<i32: 0>} : vector<16x16xi32>
    %c3_i32 = arith.constant 3 : i32
    %8 = vector.broadcast %c3_i32 : i32 to vector<16x16xi32>
    %9 = arith.shrsi %7, %8 : vector<16x16xi32>
    %10 = tpu.iota {dimensions = array<i32: 1>} : vector<16x16xi32>
    %c3_i32_4 = arith.constant 3 : i32
    %11 = vector.broadcast %c3_i32_4 : i32 to vector<16x16xi32>
    %12 = arith.shrsi %10, %11 : vector<16x16xi32>
    %13 = arith.cmpi eq, %9, %12 : vector<16x16xi32>
    %14 = vector.shape_cast %6 : vector<1x16xf32> to vector<1x16xf32>
    %15 = vector.broadcast %14 : vector<1x16xf32> to vector<16x16xf32>
    %cst_5 = arith.constant -1.000000e+30 : f32
    %16 = vector.broadcast %cst_5 : f32 to vector<16x16xf32>
    %17 = arith.select %13, %15, %16 : vector<16x16xi1>, vector<16x16xf32>
    %cst_6 = arith.constant 1.000000e+00 : f32
    %18 = vector.broadcast %cst_6 : f32 to vector<1x16xf32>
    %19 = arith.subf %18, %1 : vector<1x16xf32>
    %20 = vector.shape_cast %19 : vector<1x16xf32> to vector<1x16xf32>
    %21 = vector.broadcast %20 : vector<1x16xf32> to vector<8x16xf32>
    %22 = tpu.iota {dimensions = array<i32: 0>} : vector<8x16xi32>
    %23 = tpu.iota {dimensions = array<i32: 1>} : vector<8x16xi32>
    %c3_i32_7 = arith.constant 3 : i32
    %24 = vector.broadcast %c3_i32_7 : i32 to vector<8x16xi32>
    %25 = arith.shrsi %23, %24 : vector<8x16xi32>
    %26 = arith.cmpi eq, %22, %25 : vector<8x16xi32>
    %cst_8 = arith.constant 0.000000e+00 : f32
    %27 = vector.broadcast %cst_8 : f32 to vector<8x16xf32>
    %28 = arith.select %26, %21, %27 : vector<8x16xi1>, vector<8x16xf32>
    %cst_9 = arith.constant dense<0.000000e+00> : vector<8xf32>
    %29 = vector.multi_reduction <add>, %28, %cst_9 [1] : vector<8x16xf32> to vector<8xf32>
    %30 = vector.shape_cast %29 : vector<8xf32> to vector<8x1xf32>
    %cst_10 = arith.constant 9.99999997E-7 : f32
    %31 = vector.broadcast %cst_10 : f32 to vector<8x1xf32>
    %32 = arith.addf %30, %31 : vector<8x1xf32>
    %33 = tpu.reciprocal %32 {approx = true} : vector<8x1xf32> -> vector<8x1xf32>
    %34 = vector.broadcast %33 : vector<8x1xf32> to vector<8x16xf32>
    %35 = arith.mulf %28, %34 : vector<8x16xf32>
    %c0_11 = arith.constant 0 : index
    %c0_12 = arith.constant 0 : index
    %36 = vector.load %arg1[%c0_11, %c0_12] : memref<512x128xbf16, #tpu.memory_space<vmem>>, vector<32x32xbf16>
    %37 = arith.truncf %0 : vector<16x32xf32> to vector<16x32xbf16>
    %cst_13 = arith.constant dense<0.000000e+00> : vector<16x32xf32>
    %38 = tpu.matmul %37, %36, %cst_13 {dimension_numbers = #tpu.dot_dimension_numbers<[1], [0], [0], [1], [0, 0, 1, 1], [], []>} : vector<16x32xbf16>, vector<32x32xbf16>, vector<16x32xf32> -> vector<16x32xf32>
    %c0_14 = arith.constant 0 : index
    %c0_15 = arith.constant 0 : index
    %39 = vector.load %arg2[%c0_14, %c0_15] : memref<40x128xf32, #tpu.memory_space<vmem>>, vector<16x32xf32>
    %40 = arith.addf %38, %39 : vector<16x32xf32>
    %c32 = arith.constant 32 : index
    %c0_16 = arith.constant 0 : index
    %41 = vector.load %arg1[%c32, %c0_16] : memref<512x128xbf16, #tpu.memory_space<vmem>>, vector<32x96xbf16>
    %42 = arith.truncf %40 : vector<16x32xf32> to vector<16x32xbf16>
    %cst_17 = arith.constant dense<0.000000e+00> : vector<16x96xf32>
    %43 = tpu.matmul %42, %41, %cst_17 {dimension_numbers = #tpu.dot_dimension_numbers<[1], [0], [0], [1], [0, 0, 1, 1], [], []>} : vector<16x32xbf16>, vector<32x96xbf16>, vector<16x96xf32> -> vector<16x96xf32>
    %c16_18 = arith.constant 16 : index
    %c0_19 = arith.constant 0 : index
    %44 = vector.load %arg2[%c16_18, %c0_19] : memref<40x128xf32, #tpu.memory_space<vmem>>, vector<1x96xf32>
    %45 = vector.broadcast %44 : vector<1x96xf32> to vector<16x96xf32>
    %46 = arith.addf %43, %45 : vector<16x96xf32>
    %47 = vector.extract_strided_slice %46 {offsets = [0, 0], sizes = [16, 8], strides = [1, 1]} : vector<16x96xf32> to vector<16x8xf32>
    %48 = vector.extract_strided_slice %46 {offsets = [0, 32], sizes = [16, 8], strides = [1, 1]} : vector<16x96xf32> to vector<16x8xf32>
    %49 = vector.extract_strided_slice %46 {offsets = [0, 64], sizes = [16, 8], strides = [1, 1]} : vector<16x96xf32> to vector<16x8xf32>
    %50 = arith.truncf %47 : vector<16x8xf32> to vector<16x8xbf16>
    %51 = arith.truncf %48 : vector<16x8xf32> to vector<16x8xbf16>
    %cst_20 = arith.constant dense<0.000000e+00> : vector<16x16xf32>
    %52 = tpu.matmul %50, %51, %cst_20 {dimension_numbers = #tpu.dot_dimension_numbers<[1], [1], [0], [0], [0, 0, 1, 0], [], []>} : vector<16x8xbf16>, vector<16x8xbf16>, vector<16x16xf32> -> vector<16x16xf32>
    %53 = arith.addf %52, %17 : vector<16x16xf32>
    %cst_21 = arith.constant dense<0xFF800000> : vector<16xf32>
    %54 = vector.multi_reduction <maximumf>, %53, %cst_21 [1] : vector<16x16xf32> to vector<16xf32>
    %55 = vector.shape_cast %54 : vector<16xf32> to vector<16x1xf32>
    %56 = vector.broadcast %55 : vector<16x1xf32> to vector<16x16xf32>
    %57 = arith.subf %53, %56 : vector<16x16xf32>
    %58 = math.exp %57 : vector<16x16xf32>
    %cst_22 = arith.constant dense<0.000000e+00> : vector<16xf32>
    %59 = vector.multi_reduction <add>, %58, %cst_22 [1] : vector<16x16xf32> to vector<16xf32>
    %60 = vector.shape_cast %59 : vector<16xf32> to vector<16x1xf32>
    %61 = tpu.reciprocal %60 {approx = true} : vector<16x1xf32> -> vector<16x1xf32>
    %62 = vector.broadcast %61 : vector<16x1xf32> to vector<16x16xf32>
    %63 = arith.mulf %58, %62 : vector<16x16xf32>
    %64 = arith.truncf %63 : vector<16x16xf32> to vector<16x16xbf16>
    %65 = arith.truncf %49 : vector<16x8xf32> to vector<16x8xbf16>
    %cst_23 = arith.constant dense<0.000000e+00> : vector<16x8xf32>
    %66 = tpu.matmul %64, %65, %cst_23 {dimension_numbers = #tpu.dot_dimension_numbers<[1], [0], [0], [1], [0, 0, 1, 1], [], []>} : vector<16x16xbf16>, vector<16x8xbf16>, vector<16x8xf32> -> vector<16x8xf32>
    %c64 = arith.constant 64 : index
    %c0_24 = arith.constant 0 : index
    %67 = vector.load %arg1[%c64, %c0_24] : memref<512x128xbf16, #tpu.memory_space<vmem>>, vector<32x8xbf16>
    %68 = arith.truncf %66 : vector<16x8xf32> to vector<16x8xbf16>
    %cst_25 = arith.constant dense<0.000000e+00> : vector<16x32xf32>
    %69 = tpu.matmul %68, %67, %cst_25 {dimension_numbers = #tpu.dot_dimension_numbers<[1], [1], [0], [0], [0, 0, 1, 0], [], []>} : vector<16x8xbf16>, vector<32x8xbf16>, vector<16x32xf32> -> vector<16x32xf32>
    %70 = vector.extract_strided_slice %46 {offsets = [0, 8], sizes = [16, 8], strides = [1, 1]} : vector<16x96xf32> to vector<16x8xf32>
    %71 = vector.extract_strided_slice %46 {offsets = [0, 40], sizes = [16, 8], strides = [1, 1]} : vector<16x96xf32> to vector<16x8xf32>
    %72 = vector.extract_strided_slice %46 {offsets = [0, 72], sizes = [16, 8], strides = [1, 1]} : vector<16x96xf32> to vector<16x8xf32>
    %73 = arith.truncf %70 : vector<16x8xf32> to vector<16x8xbf16>
    %74 = arith.truncf %71 : vector<16x8xf32> to vector<16x8xbf16>
    %cst_26 = arith.constant dense<0.000000e+00> : vector<16x16xf32>
    %75 = tpu.matmul %73, %74, %cst_26 {dimension_numbers = #tpu.dot_dimension_numbers<[1], [1], [0], [0], [0, 0, 1, 0], [], []>} : vector<16x8xbf16>, vector<16x8xbf16>, vector<16x16xf32> -> vector<16x16xf32>
    %76 = arith.addf %75, %17 : vector<16x16xf32>
    %cst_27 = arith.constant dense<0xFF800000> : vector<16xf32>
    %77 = vector.multi_reduction <maximumf>, %76, %cst_27 [1] : vector<16x16xf32> to vector<16xf32>
    %78 = vector.shape_cast %77 : vector<16xf32> to vector<16x1xf32>
    %79 = vector.broadcast %78 : vector<16x1xf32> to vector<16x16xf32>
    %80 = arith.subf %76, %79 : vector<16x16xf32>
    %81 = math.exp %80 : vector<16x16xf32>
    %cst_28 = arith.constant dense<0.000000e+00> : vector<16xf32>
    %82 = vector.multi_reduction <add>, %81, %cst_28 [1] : vector<16x16xf32> to vector<16xf32>
    %83 = vector.shape_cast %82 : vector<16xf32> to vector<16x1xf32>
    %84 = tpu.reciprocal %83 {approx = true} : vector<16x1xf32> -> vector<16x1xf32>
    %85 = vector.broadcast %84 : vector<16x1xf32> to vector<16x16xf32>
    %86 = arith.mulf %81, %85 : vector<16x16xf32>
    %87 = arith.truncf %86 : vector<16x16xf32> to vector<16x16xbf16>
    %88 = arith.truncf %72 : vector<16x8xf32> to vector<16x8xbf16>
    %cst_29 = arith.constant dense<0.000000e+00> : vector<16x8xf32>
    %89 = tpu.matmul %87, %88, %cst_29 {dimension_numbers = #tpu.dot_dimension_numbers<[1], [0], [0], [1], [0, 0, 1, 1], [], []>} : vector<16x16xbf16>, vector<16x8xbf16>, vector<16x8xf32> -> vector<16x8xf32>
    %c64_30 = arith.constant 64 : index
    %c8 = arith.constant 8 : index
    %90 = vector.load %arg1[%c64_30, %c8] : memref<512x128xbf16, #tpu.memory_space<vmem>>, vector<32x8xbf16>
    %91 = arith.truncf %89 : vector<16x8xf32> to vector<16x8xbf16>
    %cst_31 = arith.constant dense<0.000000e+00> : vector<16x32xf32>
    %92 = tpu.matmul %91, %90, %cst_31 {dimension_numbers = #tpu.dot_dimension_numbers<[1], [1], [0], [0], [0, 0, 1, 0], [], []>} : vector<16x8xbf16>, vector<32x8xbf16>, vector<16x32xf32> -> vector<16x32xf32>
    %93 = arith.addf %69, %92 : vector<16x32xf32>
    %94 = vector.extract_strided_slice %46 {offsets = [0, 16], sizes = [16, 8], strides = [1, 1]} : vector<16x96xf32> to vector<16x8xf32>
    %95 = vector.extract_strided_slice %46 {offsets = [0, 48], sizes = [16, 8], strides = [1, 1]} : vector<16x96xf32> to vector<16x8xf32>
    %96 = vector.extract_strided_slice %46 {offsets = [0, 80], sizes = [16, 8], strides = [1, 1]} : vector<16x96xf32> to vector<16x8xf32>
    %97 = arith.truncf %94 : vector<16x8xf32> to vector<16x8xbf16>
    %98 = arith.truncf %95 : vector<16x8xf32> to vector<16x8xbf16>
    %cst_32 = arith.constant dense<0.000000e+00> : vector<16x16xf32>
    %99 = tpu.matmul %97, %98, %cst_32 {dimension_numbers = #tpu.dot_dimension_numbers<[1], [1], [0], [0], [0, 0, 1, 0], [], []>} : vector<16x8xbf16>, vector<16x8xbf16>, vector<16x16xf32> -> vector<16x16xf32>
    %100 = arith.addf %99, %17 : vector<16x16xf32>
    %cst_33 = arith.constant dense<0xFF800000> : vector<16xf32>
    %101 = vector.multi_reduction <maximumf>, %100, %cst_33 [1] : vector<16x16xf32> to vector<16xf32>
    %102 = vector.shape_cast %101 : vector<16xf32> to vector<16x1xf32>
    %103 = vector.broadcast %102 : vector<16x1xf32> to vector<16x16xf32>
    %104 = arith.subf %100, %103 : vector<16x16xf32>
    %105 = math.exp %104 : vector<16x16xf32>
    %cst_34 = arith.constant dense<0.000000e+00> : vector<16xf32>
    %106 = vector.multi_reduction <add>, %105, %cst_34 [1] : vector<16x16xf32> to vector<16xf32>
    %107 = vector.shape_cast %106 : vector<16xf32> to vector<16x1xf32>
    %108 = tpu.reciprocal %107 {approx = true} : vector<16x1xf32> -> vector<16x1xf32>
    %109 = vector.broadcast %108 : vector<16x1xf32> to vector<16x16xf32>
    %110 = arith.mulf %105, %109 : vector<16x16xf32>
    %111 = arith.truncf %110 : vector<16x16xf32> to vector<16x16xbf16>
    %112 = arith.truncf %96 : vector<16x8xf32> to vector<16x8xbf16>
    %cst_35 = arith.constant dense<0.000000e+00> : vector<16x8xf32>
    %113 = tpu.matmul %111, %112, %cst_35 {dimension_numbers = #tpu.dot_dimension_numbers<[1], [0], [0], [1], [0, 0, 1, 1], [], []>} : vector<16x16xbf16>, vector<16x8xbf16>, vector<16x8xf32> -> vector<16x8xf32>
    %c64_36 = arith.constant 64 : index
    %c16_37 = arith.constant 16 : index
    %114 = vector.load %arg1[%c64_36, %c16_37] : memref<512x128xbf16, #tpu.memory_space<vmem>>, vector<32x8xbf16>
    %115 = arith.truncf %113 : vector<16x8xf32> to vector<16x8xbf16>
    %cst_38 = arith.constant dense<0.000000e+00> : vector<16x32xf32>
    %116 = tpu.matmul %115, %114, %cst_38 {dimension_numbers = #tpu.dot_dimension_numbers<[1], [1], [0], [0], [0, 0, 1, 0], [], []>} : vector<16x8xbf16>, vector<32x8xbf16>, vector<16x32xf32> -> vector<16x32xf32>
    %117 = arith.addf %93, %116 : vector<16x32xf32>
    %118 = vector.extract_strided_slice %46 {offsets = [0, 24], sizes = [16, 8], strides = [1, 1]} : vector<16x96xf32> to vector<16x8xf32>
    %119 = vector.extract_strided_slice %46 {offsets = [0, 56], sizes = [16, 8], strides = [1, 1]} : vector<16x96xf32> to vector<16x8xf32>
    %120 = vector.extract_strided_slice %46 {offsets = [0, 88], sizes = [16, 8], strides = [1, 1]} : vector<16x96xf32> to vector<16x8xf32>
    %121 = arith.truncf %118 : vector<16x8xf32> to vector<16x8xbf16>
    %122 = arith.truncf %119 : vector<16x8xf32> to vector<16x8xbf16>
    %cst_39 = arith.constant dense<0.000000e+00> : vector<16x16xf32>
    %123 = tpu.matmul %121, %122, %cst_39 {dimension_numbers = #tpu.dot_dimension_numbers<[1], [1], [0], [0], [0, 0, 1, 0], [], []>} : vector<16x8xbf16>, vector<16x8xbf16>, vector<16x16xf32> -> vector<16x16xf32>
    %124 = arith.addf %123, %17 : vector<16x16xf32>
    %cst_40 = arith.constant dense<0xFF800000> : vector<16xf32>
    %125 = vector.multi_reduction <maximumf>, %124, %cst_40 [1] : vector<16x16xf32> to vector<16xf32>
    %126 = vector.shape_cast %125 : vector<16xf32> to vector<16x1xf32>
    %127 = vector.broadcast %126 : vector<16x1xf32> to vector<16x16xf32>
    %128 = arith.subf %124, %127 : vector<16x16xf32>
    %129 = math.exp %128 : vector<16x16xf32>
    %cst_41 = arith.constant dense<0.000000e+00> : vector<16xf32>
    %130 = vector.multi_reduction <add>, %129, %cst_41 [1] : vector<16x16xf32> to vector<16xf32>
    %131 = vector.shape_cast %130 : vector<16xf32> to vector<16x1xf32>
    %132 = tpu.reciprocal %131 {approx = true} : vector<16x1xf32> -> vector<16x1xf32>
    %133 = vector.broadcast %132 : vector<16x1xf32> to vector<16x16xf32>
    %134 = arith.mulf %129, %133 : vector<16x16xf32>
    %135 = arith.truncf %134 : vector<16x16xf32> to vector<16x16xbf16>
    %136 = arith.truncf %120 : vector<16x8xf32> to vector<16x8xbf16>
    %cst_42 = arith.constant dense<0.000000e+00> : vector<16x8xf32>
    %137 = tpu.matmul %135, %136, %cst_42 {dimension_numbers = #tpu.dot_dimension_numbers<[1], [0], [0], [1], [0, 0, 1, 1], [], []>} : vector<16x16xbf16>, vector<16x8xbf16>, vector<16x8xf32> -> vector<16x8xf32>
    %c64_43 = arith.constant 64 : index
    %c24 = arith.constant 24 : index
    %138 = vector.load %arg1[%c64_43, %c24] : memref<512x128xbf16, #tpu.memory_space<vmem>>, vector<32x8xbf16>
    %139 = arith.truncf %137 : vector<16x8xf32> to vector<16x8xbf16>
    %cst_44 = arith.constant dense<0.000000e+00> : vector<16x32xf32>
    %140 = tpu.matmul %139, %138, %cst_44 {dimension_numbers = #tpu.dot_dimension_numbers<[1], [1], [0], [0], [0, 0, 1, 0], [], []>} : vector<16x8xbf16>, vector<32x8xbf16>, vector<16x32xf32> -> vector<16x32xf32>
    %141 = arith.addf %117, %140 : vector<16x32xf32>
    %c17 = arith.constant 17 : index
    %c0_45 = arith.constant 0 : index
    %142 = vector.load %arg2[%c17, %c0_45] : memref<40x128xf32, #tpu.memory_space<vmem>>, vector<1x32xf32>
    %143 = vector.broadcast %142 : vector<1x32xf32> to vector<16x32xf32>
    %144 = arith.addf %141, %143 : vector<16x32xf32>
    %145 = arith.addf %40, %144 : vector<16x32xf32>
    %c18 = arith.constant 18 : index
    %c0_46 = arith.constant 0 : index
    %146 = vector.load %arg2[%c18, %c0_46] : memref<40x128xf32, #tpu.memory_space<vmem>>, vector<1x32xf32>
    %c19 = arith.constant 19 : index
    %c0_47 = arith.constant 0 : index
    %147 = vector.load %arg2[%c19, %c0_47] : memref<40x128xf32, #tpu.memory_space<vmem>>, vector<1x32xf32>
    %cst_48 = arith.constant dense<0.000000e+00> : vector<16xf32>
    %148 = vector.multi_reduction <add>, %145, %cst_48 [1] : vector<16x32xf32> to vector<16xf32>
    %149 = vector.shape_cast %148 : vector<16xf32> to vector<16x1xf32>
    %cst_49 = arith.constant 3.200000e+01 : f32
    %150 = vector.broadcast %cst_49 : f32 to vector<16x1xf32>
    %151 = arith.divf %149, %150 : vector<16x1xf32>
    %152 = vector.broadcast %151 : vector<16x1xf32> to vector<16x32xf32>
    %153 = arith.subf %145, %152 : vector<16x32xf32>
    %154 = arith.mulf %153, %153 : vector<16x32xf32>
    %cst_50 = arith.constant dense<0.000000e+00> : vector<16xf32>
    %155 = vector.multi_reduction <add>, %154, %cst_50 [1] : vector<16x32xf32> to vector<16xf32>
    %156 = vector.shape_cast %155 : vector<16xf32> to vector<16x1xf32>
    %cst_51 = arith.constant 3.200000e+01 : f32
    %157 = vector.broadcast %cst_51 : f32 to vector<16x1xf32>
    %158 = arith.divf %156, %157 : vector<16x1xf32>
    %159 = vector.broadcast %151 : vector<16x1xf32> to vector<16x32xf32>
    %160 = arith.subf %145, %159 : vector<16x32xf32>
    %cst_52 = arith.constant 9.99999974E-6 : f32
    %161 = vector.broadcast %cst_52 : f32 to vector<16x1xf32>
    %162 = arith.addf %158, %161 : vector<16x1xf32>
    %163 = math.rsqrt %162 : vector<16x1xf32>
    %164 = vector.broadcast %163 : vector<16x1xf32> to vector<16x32xf32>
    %165 = arith.mulf %160, %164 : vector<16x32xf32>
    %166 = vector.broadcast %146 : vector<1x32xf32> to vector<16x32xf32>
    %167 = arith.mulf %165, %166 : vector<16x32xf32>
    %168 = vector.broadcast %147 : vector<1x32xf32> to vector<16x32xf32>
    %169 = arith.addf %167, %168 : vector<16x32xf32>
    %c96 = arith.constant 96 : index
    %c0_53 = arith.constant 0 : index
    %170 = vector.load %arg1[%c96, %c0_53] : memref<512x128xbf16, #tpu.memory_space<vmem>>, vector<32x64xbf16>
    %171 = arith.truncf %169 : vector<16x32xf32> to vector<16x32xbf16>
    %cst_54 = arith.constant dense<0.000000e+00> : vector<16x64xf32>
    %172 = tpu.matmul %171, %170, %cst_54 {dimension_numbers = #tpu.dot_dimension_numbers<[1], [0], [0], [1], [0, 0, 1, 1], [], []>} : vector<16x32xbf16>, vector<32x64xbf16>, vector<16x64xf32> -> vector<16x64xf32>
    %c20 = arith.constant 20 : index
    %c0_55 = arith.constant 0 : index
    %173 = vector.load %arg2[%c20, %c0_55] : memref<40x128xf32, #tpu.memory_space<vmem>>, vector<1x64xf32>
    %174 = vector.broadcast %173 : vector<1x64xf32> to vector<16x64xf32>
    %175 = arith.addf %172, %174 : vector<16x64xf32>
    %cst_56 = arith.constant 0.000000e+00 : f32
    %176 = vector.broadcast %cst_56 : f32 to vector<16x64xf32>
    %177 = arith.maximumf %175, %176 : vector<16x64xf32>
    %c128 = arith.constant 128 : index
    %c0_57 = arith.constant 0 : index
    %178 = vector.load %arg1[%c128, %c0_57] : memref<512x128xbf16, #tpu.memory_space<vmem>>, vector<64x32xbf16>
    %179 = arith.truncf %177 : vector<16x64xf32> to vector<16x64xbf16>
    %cst_58 = arith.constant dense<0.000000e+00> : vector<16x32xf32>
    %180 = tpu.matmul %179, %178, %cst_58 {dimension_numbers = #tpu.dot_dimension_numbers<[1], [0], [0], [1], [0, 0, 1, 1], [], []>} : vector<16x64xbf16>, vector<64x32xbf16>, vector<16x32xf32> -> vector<16x32xf32>
    %c21 = arith.constant 21 : index
    %c0_59 = arith.constant 0 : index
    %181 = vector.load %arg2[%c21, %c0_59] : memref<40x128xf32, #tpu.memory_space<vmem>>, vector<1x32xf32>
    %182 = vector.broadcast %181 : vector<1x32xf32> to vector<16x32xf32>
    %183 = arith.addf %180, %182 : vector<16x32xf32>
    %184 = arith.addf %169, %183 : vector<16x32xf32>
    %c22 = arith.constant 22 : index
    %c0_60 = arith.constant 0 : index
    %185 = vector.load %arg2[%c22, %c0_60] : memref<40x128xf32, #tpu.memory_space<vmem>>, vector<1x32xf32>
    %c23 = arith.constant 23 : index
    %c0_61 = arith.constant 0 : index
    %186 = vector.load %arg2[%c23, %c0_61] : memref<40x128xf32, #tpu.memory_space<vmem>>, vector<1x32xf32>
    %cst_62 = arith.constant dense<0.000000e+00> : vector<16xf32>
    %187 = vector.multi_reduction <add>, %184, %cst_62 [1] : vector<16x32xf32> to vector<16xf32>
    %188 = vector.shape_cast %187 : vector<16xf32> to vector<16x1xf32>
    %cst_63 = arith.constant 3.200000e+01 : f32
    %189 = vector.broadcast %cst_63 : f32 to vector<16x1xf32>
    %190 = arith.divf %188, %189 : vector<16x1xf32>
    %191 = vector.broadcast %190 : vector<16x1xf32> to vector<16x32xf32>
    %192 = arith.subf %184, %191 : vector<16x32xf32>
    %193 = arith.mulf %192, %192 : vector<16x32xf32>
    %cst_64 = arith.constant dense<0.000000e+00> : vector<16xf32>
    %194 = vector.multi_reduction <add>, %193, %cst_64 [1] : vector<16x32xf32> to vector<16xf32>
    %195 = vector.shape_cast %194 : vector<16xf32> to vector<16x1xf32>
    %cst_65 = arith.constant 3.200000e+01 : f32
    %196 = vector.broadcast %cst_65 : f32 to vector<16x1xf32>
    %197 = arith.divf %195, %196 : vector<16x1xf32>
    %198 = vector.broadcast %190 : vector<16x1xf32> to vector<16x32xf32>
    %199 = arith.subf %184, %198 : vector<16x32xf32>
    %cst_66 = arith.constant 9.99999974E-6 : f32
    %200 = vector.broadcast %cst_66 : f32 to vector<16x1xf32>
    %201 = arith.addf %197, %200 : vector<16x1xf32>
    %202 = math.rsqrt %201 : vector<16x1xf32>
    %203 = vector.broadcast %202 : vector<16x1xf32> to vector<16x32xf32>
    %204 = arith.mulf %199, %203 : vector<16x32xf32>
    %205 = vector.broadcast %185 : vector<1x32xf32> to vector<16x32xf32>
    %206 = arith.mulf %204, %205 : vector<16x32xf32>
    %207 = vector.broadcast %186 : vector<1x32xf32> to vector<16x32xf32>
    %208 = arith.addf %206, %207 : vector<16x32xf32>
    %c192 = arith.constant 192 : index
    %c0_67 = arith.constant 0 : index
    %209 = vector.load %arg1[%c192, %c0_67] : memref<512x128xbf16, #tpu.memory_space<vmem>>, vector<32x96xbf16>
    %210 = arith.truncf %208 : vector<16x32xf32> to vector<16x32xbf16>
    %cst_68 = arith.constant dense<0.000000e+00> : vector<16x96xf32>
    %211 = tpu.matmul %210, %209, %cst_68 {dimension_numbers = #tpu.dot_dimension_numbers<[1], [0], [0], [1], [0, 0, 1, 1], [], []>} : vector<16x32xbf16>, vector<32x96xbf16>, vector<16x96xf32> -> vector<16x96xf32>
    %c24_69 = arith.constant 24 : index
    %c0_70 = arith.constant 0 : index
    %212 = vector.load %arg2[%c24_69, %c0_70] : memref<40x128xf32, #tpu.memory_space<vmem>>, vector<1x96xf32>
    %213 = vector.broadcast %212 : vector<1x96xf32> to vector<16x96xf32>
    %214 = arith.addf %211, %213 : vector<16x96xf32>
    %215 = vector.extract_strided_slice %214 {offsets = [0, 0], sizes = [16, 8], strides = [1, 1]} : vector<16x96xf32> to vector<16x8xf32>
    %216 = vector.extract_strided_slice %214 {offsets = [0, 32], sizes = [16, 8], strides = [1, 1]} : vector<16x96xf32> to vector<16x8xf32>
    %217 = vector.extract_strided_slice %214 {offsets = [0, 64], sizes = [16, 8], strides = [1, 1]} : vector<16x96xf32> to vector<16x8xf32>
    %218 = arith.truncf %215 : vector<16x8xf32> to vector<16x8xbf16>
    %219 = arith.truncf %216 : vector<16x8xf32> to vector<16x8xbf16>
    %cst_71 = arith.constant dense<0.000000e+00> : vector<16x16xf32>
    %220 = tpu.matmul %218, %219, %cst_71 {dimension_numbers = #tpu.dot_dimension_numbers<[1], [1], [0], [0], [0, 0, 1, 0], [], []>} : vector<16x8xbf16>, vector<16x8xbf16>, vector<16x16xf32> -> vector<16x16xf32>
    %221 = arith.addf %220, %17 : vector<16x16xf32>
    %cst_72 = arith.constant dense<0xFF800000> : vector<16xf32>
    %222 = vector.multi_reduction <maximumf>, %221, %cst_72 [1] : vector<16x16xf32> to vector<16xf32>
    %223 = vector.shape_cast %222 : vector<16xf32> to vector<16x1xf32>
    %224 = vector.broadcast %223 : vector<16x1xf32> to vector<16x16xf32>
    %225 = arith.subf %221, %224 : vector<16x16xf32>
    %226 = math.exp %225 : vector<16x16xf32>
    %cst_73 = arith.constant dense<0.000000e+00> : vector<16xf32>
    %227 = vector.multi_reduction <add>, %226, %cst_73 [1] : vector<16x16xf32> to vector<16xf32>
    %228 = vector.shape_cast %227 : vector<16xf32> to vector<16x1xf32>
    %229 = tpu.reciprocal %228 {approx = true} : vector<16x1xf32> -> vector<16x1xf32>
    %230 = vector.broadcast %229 : vector<16x1xf32> to vector<16x16xf32>
    %231 = arith.mulf %226, %230 : vector<16x16xf32>
    %232 = arith.truncf %231 : vector<16x16xf32> to vector<16x16xbf16>
    %233 = arith.truncf %217 : vector<16x8xf32> to vector<16x8xbf16>
    %cst_74 = arith.constant dense<0.000000e+00> : vector<16x8xf32>
    %234 = tpu.matmul %232, %233, %cst_74 {dimension_numbers = #tpu.dot_dimension_numbers<[1], [0], [0], [1], [0, 0, 1, 1], [], []>} : vector<16x16xbf16>, vector<16x8xbf16>, vector<16x8xf32> -> vector<16x8xf32>
    %c224 = arith.constant 224 : index
    %c0_75 = arith.constant 0 : index
    %235 = vector.load %arg1[%c224, %c0_75] : memref<512x128xbf16, #tpu.memory_space<vmem>>, vector<32x8xbf16>
    %236 = arith.truncf %234 : vector<16x8xf32> to vector<16x8xbf16>
    %cst_76 = arith.constant dense<0.000000e+00> : vector<16x32xf32>
    %237 = tpu.matmul %236, %235, %cst_76 {dimension_numbers = #tpu.dot_dimension_numbers<[1], [1], [0], [0], [0, 0, 1, 0], [], []>} : vector<16x8xbf16>, vector<32x8xbf16>, vector<16x32xf32> -> vector<16x32xf32>
    %238 = vector.extract_strided_slice %214 {offsets = [0, 8], sizes = [16, 8], strides = [1, 1]} : vector<16x96xf32> to vector<16x8xf32>
    %239 = vector.extract_strided_slice %214 {offsets = [0, 40], sizes = [16, 8], strides = [1, 1]} : vector<16x96xf32> to vector<16x8xf32>
    %240 = vector.extract_strided_slice %214 {offsets = [0, 72], sizes = [16, 8], strides = [1, 1]} : vector<16x96xf32> to vector<16x8xf32>
    %241 = arith.truncf %238 : vector<16x8xf32> to vector<16x8xbf16>
    %242 = arith.truncf %239 : vector<16x8xf32> to vector<16x8xbf16>
    %cst_77 = arith.constant dense<0.000000e+00> : vector<16x16xf32>
    %243 = tpu.matmul %241, %242, %cst_77 {dimension_numbers = #tpu.dot_dimension_numbers<[1], [1], [0], [0], [0, 0, 1, 0], [], []>} : vector<16x8xbf16>, vector<16x8xbf16>, vector<16x16xf32> -> vector<16x16xf32>
    %244 = arith.addf %243, %17 : vector<16x16xf32>
    %cst_78 = arith.constant dense<0xFF800000> : vector<16xf32>
    %245 = vector.multi_reduction <maximumf>, %244, %cst_78 [1] : vector<16x16xf32> to vector<16xf32>
    %246 = vector.shape_cast %245 : vector<16xf32> to vector<16x1xf32>
    %247 = vector.broadcast %246 : vector<16x1xf32> to vector<16x16xf32>
    %248 = arith.subf %244, %247 : vector<16x16xf32>
    %249 = math.exp %248 : vector<16x16xf32>
    %cst_79 = arith.constant dense<0.000000e+00> : vector<16xf32>
    %250 = vector.multi_reduction <add>, %249, %cst_79 [1] : vector<16x16xf32> to vector<16xf32>
    %251 = vector.shape_cast %250 : vector<16xf32> to vector<16x1xf32>
    %252 = tpu.reciprocal %251 {approx = true} : vector<16x1xf32> -> vector<16x1xf32>
    %253 = vector.broadcast %252 : vector<16x1xf32> to vector<16x16xf32>
    %254 = arith.mulf %249, %253 : vector<16x16xf32>
    %255 = arith.truncf %254 : vector<16x16xf32> to vector<16x16xbf16>
    %256 = arith.truncf %240 : vector<16x8xf32> to vector<16x8xbf16>
    %cst_80 = arith.constant dense<0.000000e+00> : vector<16x8xf32>
    %257 = tpu.matmul %255, %256, %cst_80 {dimension_numbers = #tpu.dot_dimension_numbers<[1], [0], [0], [1], [0, 0, 1, 1], [], []>} : vector<16x16xbf16>, vector<16x8xbf16>, vector<16x8xf32> -> vector<16x8xf32>
    %c224_81 = arith.constant 224 : index
    %c8_82 = arith.constant 8 : index
    %258 = vector.load %arg1[%c224_81, %c8_82] : memref<512x128xbf16, #tpu.memory_space<vmem>>, vector<32x8xbf16>
    %259 = arith.truncf %257 : vector<16x8xf32> to vector<16x8xbf16>
    %cst_83 = arith.constant dense<0.000000e+00> : vector<16x32xf32>
    %260 = tpu.matmul %259, %258, %cst_83 {dimension_numbers = #tpu.dot_dimension_numbers<[1], [1], [0], [0], [0, 0, 1, 0], [], []>} : vector<16x8xbf16>, vector<32x8xbf16>, vector<16x32xf32> -> vector<16x32xf32>
    %261 = arith.addf %237, %260 : vector<16x32xf32>
    %262 = vector.extract_strided_slice %214 {offsets = [0, 16], sizes = [16, 8], strides = [1, 1]} : vector<16x96xf32> to vector<16x8xf32>
    %263 = vector.extract_strided_slice %214 {offsets = [0, 48], sizes = [16, 8], strides = [1, 1]} : vector<16x96xf32> to vector<16x8xf32>
    %264 = vector.extract_strided_slice %214 {offsets = [0, 80], sizes = [16, 8], strides = [1, 1]} : vector<16x96xf32> to vector<16x8xf32>
    %265 = arith.truncf %262 : vector<16x8xf32> to vector<16x8xbf16>
    %266 = arith.truncf %263 : vector<16x8xf32> to vector<16x8xbf16>
    %cst_84 = arith.constant dense<0.000000e+00> : vector<16x16xf32>
    %267 = tpu.matmul %265, %266, %cst_84 {dimension_numbers = #tpu.dot_dimension_numbers<[1], [1], [0], [0], [0, 0, 1, 0], [], []>} : vector<16x8xbf16>, vector<16x8xbf16>, vector<16x16xf32> -> vector<16x16xf32>
    %268 = arith.addf %267, %17 : vector<16x16xf32>
    %cst_85 = arith.constant dense<0xFF800000> : vector<16xf32>
    %269 = vector.multi_reduction <maximumf>, %268, %cst_85 [1] : vector<16x16xf32> to vector<16xf32>
    %270 = vector.shape_cast %269 : vector<16xf32> to vector<16x1xf32>
    %271 = vector.broadcast %270 : vector<16x1xf32> to vector<16x16xf32>
    %272 = arith.subf %268, %271 : vector<16x16xf32>
    %273 = math.exp %272 : vector<16x16xf32>
    %cst_86 = arith.constant dense<0.000000e+00> : vector<16xf32>
    %274 = vector.multi_reduction <add>, %273, %cst_86 [1] : vector<16x16xf32> to vector<16xf32>
    %275 = vector.shape_cast %274 : vector<16xf32> to vector<16x1xf32>
    %276 = tpu.reciprocal %275 {approx = true} : vector<16x1xf32> -> vector<16x1xf32>
    %277 = vector.broadcast %276 : vector<16x1xf32> to vector<16x16xf32>
    %278 = arith.mulf %273, %277 : vector<16x16xf32>
    %279 = arith.truncf %278 : vector<16x16xf32> to vector<16x16xbf16>
    %280 = arith.truncf %264 : vector<16x8xf32> to vector<16x8xbf16>
    %cst_87 = arith.constant dense<0.000000e+00> : vector<16x8xf32>
    %281 = tpu.matmul %279, %280, %cst_87 {dimension_numbers = #tpu.dot_dimension_numbers<[1], [0], [0], [1], [0, 0, 1, 1], [], []>} : vector<16x16xbf16>, vector<16x8xbf16>, vector<16x8xf32> -> vector<16x8xf32>
    %c224_88 = arith.constant 224 : index
    %c16_89 = arith.constant 16 : index
    %282 = vector.load %arg1[%c224_88, %c16_89] : memref<512x128xbf16, #tpu.memory_space<vmem>>, vector<32x8xbf16>
    %283 = arith.truncf %281 : vector<16x8xf32> to vector<16x8xbf16>
    %cst_90 = arith.constant dense<0.000000e+00> : vector<16x32xf32>
    %284 = tpu.matmul %283, %282, %cst_90 {dimension_numbers = #tpu.dot_dimension_numbers<[1], [1], [0], [0], [0, 0, 1, 0], [], []>} : vector<16x8xbf16>, vector<32x8xbf16>, vector<16x32xf32> -> vector<16x32xf32>
    %285 = arith.addf %261, %284 : vector<16x32xf32>
    %286 = vector.extract_strided_slice %214 {offsets = [0, 24], sizes = [16, 8], strides = [1, 1]} : vector<16x96xf32> to vector<16x8xf32>
    %287 = vector.extract_strided_slice %214 {offsets = [0, 56], sizes = [16, 8], strides = [1, 1]} : vector<16x96xf32> to vector<16x8xf32>
    %288 = vector.extract_strided_slice %214 {offsets = [0, 88], sizes = [16, 8], strides = [1, 1]} : vector<16x96xf32> to vector<16x8xf32>
    %289 = arith.truncf %286 : vector<16x8xf32> to vector<16x8xbf16>
    %290 = arith.truncf %287 : vector<16x8xf32> to vector<16x8xbf16>
    %cst_91 = arith.constant dense<0.000000e+00> : vector<16x16xf32>
    %291 = tpu.matmul %289, %290, %cst_91 {dimension_numbers = #tpu.dot_dimension_numbers<[1], [1], [0], [0], [0, 0, 1, 0], [], []>} : vector<16x8xbf16>, vector<16x8xbf16>, vector<16x16xf32> -> vector<16x16xf32>
    %292 = arith.addf %291, %17 : vector<16x16xf32>
    %cst_92 = arith.constant dense<0xFF800000> : vector<16xf32>
    %293 = vector.multi_reduction <maximumf>, %292, %cst_92 [1] : vector<16x16xf32> to vector<16xf32>
    %294 = vector.shape_cast %293 : vector<16xf32> to vector<16x1xf32>
    %295 = vector.broadcast %294 : vector<16x1xf32> to vector<16x16xf32>
    %296 = arith.subf %292, %295 : vector<16x16xf32>
    %297 = math.exp %296 : vector<16x16xf32>
    %cst_93 = arith.constant dense<0.000000e+00> : vector<16xf32>
    %298 = vector.multi_reduction <add>, %297, %cst_93 [1] : vector<16x16xf32> to vector<16xf32>
    %299 = vector.shape_cast %298 : vector<16xf32> to vector<16x1xf32>
    %300 = tpu.reciprocal %299 {approx = true} : vector<16x1xf32> -> vector<16x1xf32>
    %301 = vector.broadcast %300 : vector<16x1xf32> to vector<16x16xf32>
    %302 = arith.mulf %297, %301 : vector<16x16xf32>
    %303 = arith.truncf %302 : vector<16x16xf32> to vector<16x16xbf16>
    %304 = arith.truncf %288 : vector<16x8xf32> to vector<16x8xbf16>
    %cst_94 = arith.constant dense<0.000000e+00> : vector<16x8xf32>
    %305 = tpu.matmul %303, %304, %cst_94 {dimension_numbers = #tpu.dot_dimension_numbers<[1], [0], [0], [1], [0, 0, 1, 1], [], []>} : vector<16x16xbf16>, vector<16x8xbf16>, vector<16x8xf32> -> vector<16x8xf32>
    %c224_95 = arith.constant 224 : index
    %c24_96 = arith.constant 24 : index
    %306 = vector.load %arg1[%c224_95, %c24_96] : memref<512x128xbf16, #tpu.memory_space<vmem>>, vector<32x8xbf16>
    %307 = arith.truncf %305 : vector<16x8xf32> to vector<16x8xbf16>
    %cst_97 = arith.constant dense<0.000000e+00> : vector<16x32xf32>
    %308 = tpu.matmul %307, %306, %cst_97 {dimension_numbers = #tpu.dot_dimension_numbers<[1], [1], [0], [0], [0, 0, 1, 0], [], []>} : vector<16x8xbf16>, vector<32x8xbf16>, vector<16x32xf32> -> vector<16x32xf32>
    %309 = arith.addf %285, %308 : vector<16x32xf32>
    %c25 = arith.constant 25 : index
    %c0_98 = arith.constant 0 : index
    %310 = vector.load %arg2[%c25, %c0_98] : memref<40x128xf32, #tpu.memory_space<vmem>>, vector<1x32xf32>
    %311 = vector.broadcast %310 : vector<1x32xf32> to vector<16x32xf32>
    %312 = arith.addf %309, %311 : vector<16x32xf32>
    %313 = arith.addf %208, %312 : vector<16x32xf32>
    %c26 = arith.constant 26 : index
    %c0_99 = arith.constant 0 : index
    %314 = vector.load %arg2[%c26, %c0_99] : memref<40x128xf32, #tpu.memory_space<vmem>>, vector<1x32xf32>
    %c27 = arith.constant 27 : index
    %c0_100 = arith.constant 0 : index
    %315 = vector.load %arg2[%c27, %c0_100] : memref<40x128xf32, #tpu.memory_space<vmem>>, vector<1x32xf32>
    %cst_101 = arith.constant dense<0.000000e+00> : vector<16xf32>
    %316 = vector.multi_reduction <add>, %313, %cst_101 [1] : vector<16x32xf32> to vector<16xf32>
    %317 = vector.shape_cast %316 : vector<16xf32> to vector<16x1xf32>
    %cst_102 = arith.constant 3.200000e+01 : f32
    %318 = vector.broadcast %cst_102 : f32 to vector<16x1xf32>
    %319 = arith.divf %317, %318 : vector<16x1xf32>
    %320 = vector.broadcast %319 : vector<16x1xf32> to vector<16x32xf32>
    %321 = arith.subf %313, %320 : vector<16x32xf32>
    %322 = arith.mulf %321, %321 : vector<16x32xf32>
    %cst_103 = arith.constant dense<0.000000e+00> : vector<16xf32>
    %323 = vector.multi_reduction <add>, %322, %cst_103 [1] : vector<16x32xf32> to vector<16xf32>
    %324 = vector.shape_cast %323 : vector<16xf32> to vector<16x1xf32>
    %cst_104 = arith.constant 3.200000e+01 : f32
    %325 = vector.broadcast %cst_104 : f32 to vector<16x1xf32>
    %326 = arith.divf %324, %325 : vector<16x1xf32>
    %327 = vector.broadcast %319 : vector<16x1xf32> to vector<16x32xf32>
    %328 = arith.subf %313, %327 : vector<16x32xf32>
    %cst_105 = arith.constant 9.99999974E-6 : f32
    %329 = vector.broadcast %cst_105 : f32 to vector<16x1xf32>
    %330 = arith.addf %326, %329 : vector<16x1xf32>
    %331 = math.rsqrt %330 : vector<16x1xf32>
    %332 = vector.broadcast %331 : vector<16x1xf32> to vector<16x32xf32>
    %333 = arith.mulf %328, %332 : vector<16x32xf32>
    %334 = vector.broadcast %314 : vector<1x32xf32> to vector<16x32xf32>
    %335 = arith.mulf %333, %334 : vector<16x32xf32>
    %336 = vector.broadcast %315 : vector<1x32xf32> to vector<16x32xf32>
    %337 = arith.addf %335, %336 : vector<16x32xf32>
    %c256 = arith.constant 256 : index
    %c0_106 = arith.constant 0 : index
    %338 = vector.load %arg1[%c256, %c0_106] : memref<512x128xbf16, #tpu.memory_space<vmem>>, vector<32x64xbf16>
    %339 = arith.truncf %337 : vector<16x32xf32> to vector<16x32xbf16>
    %cst_107 = arith.constant dense<0.000000e+00> : vector<16x64xf32>
    %340 = tpu.matmul %339, %338, %cst_107 {dimension_numbers = #tpu.dot_dimension_numbers<[1], [0], [0], [1], [0, 0, 1, 1], [], []>} : vector<16x32xbf16>, vector<32x64xbf16>, vector<16x64xf32> -> vector<16x64xf32>
    %c28 = arith.constant 28 : index
    %c0_108 = arith.constant 0 : index
    %341 = vector.load %arg2[%c28, %c0_108] : memref<40x128xf32, #tpu.memory_space<vmem>>, vector<1x64xf32>
    %342 = vector.broadcast %341 : vector<1x64xf32> to vector<16x64xf32>
    %343 = arith.addf %340, %342 : vector<16x64xf32>
    %cst_109 = arith.constant 0.000000e+00 : f32
    %344 = vector.broadcast %cst_109 : f32 to vector<16x64xf32>
    %345 = arith.maximumf %343, %344 : vector<16x64xf32>
    %c288 = arith.constant 288 : index
    %c0_110 = arith.constant 0 : index
    %346 = vector.load %arg1[%c288, %c0_110] : memref<512x128xbf16, #tpu.memory_space<vmem>>, vector<64x32xbf16>
    %347 = arith.truncf %345 : vector<16x64xf32> to vector<16x64xbf16>
    %cst_111 = arith.constant dense<0.000000e+00> : vector<16x32xf32>
    %348 = tpu.matmul %347, %346, %cst_111 {dimension_numbers = #tpu.dot_dimension_numbers<[1], [0], [0], [1], [0, 0, 1, 1], [], []>} : vector<16x64xbf16>, vector<64x32xbf16>, vector<16x32xf32> -> vector<16x32xf32>
    %c29 = arith.constant 29 : index
    %c0_112 = arith.constant 0 : index
    %349 = vector.load %arg2[%c29, %c0_112] : memref<40x128xf32, #tpu.memory_space<vmem>>, vector<1x32xf32>
    %350 = vector.broadcast %349 : vector<1x32xf32> to vector<16x32xf32>
    %351 = arith.addf %348, %350 : vector<16x32xf32>
    %352 = arith.addf %337, %351 : vector<16x32xf32>
    %c30 = arith.constant 30 : index
    %c0_113 = arith.constant 0 : index
    %353 = vector.load %arg2[%c30, %c0_113] : memref<40x128xf32, #tpu.memory_space<vmem>>, vector<1x32xf32>
    %c31 = arith.constant 31 : index
    %c0_114 = arith.constant 0 : index
    %354 = vector.load %arg2[%c31, %c0_114] : memref<40x128xf32, #tpu.memory_space<vmem>>, vector<1x32xf32>
    %cst_115 = arith.constant dense<0.000000e+00> : vector<16xf32>
    %355 = vector.multi_reduction <add>, %352, %cst_115 [1] : vector<16x32xf32> to vector<16xf32>
    %356 = vector.shape_cast %355 : vector<16xf32> to vector<16x1xf32>
    %cst_116 = arith.constant 3.200000e+01 : f32
    %357 = vector.broadcast %cst_116 : f32 to vector<16x1xf32>
    %358 = arith.divf %356, %357 : vector<16x1xf32>
    %359 = vector.broadcast %358 : vector<16x1xf32> to vector<16x32xf32>
    %360 = arith.subf %352, %359 : vector<16x32xf32>
    %361 = arith.mulf %360, %360 : vector<16x32xf32>
    %cst_117 = arith.constant dense<0.000000e+00> : vector<16xf32>
    %362 = vector.multi_reduction <add>, %361, %cst_117 [1] : vector<16x32xf32> to vector<16xf32>
    %363 = vector.shape_cast %362 : vector<16xf32> to vector<16x1xf32>
    %cst_118 = arith.constant 3.200000e+01 : f32
    %364 = vector.broadcast %cst_118 : f32 to vector<16x1xf32>
    %365 = arith.divf %363, %364 : vector<16x1xf32>
    %366 = vector.broadcast %358 : vector<16x1xf32> to vector<16x32xf32>
    %367 = arith.subf %352, %366 : vector<16x32xf32>
    %cst_119 = arith.constant 9.99999974E-6 : f32
    %368 = vector.broadcast %cst_119 : f32 to vector<16x1xf32>
    %369 = arith.addf %365, %368 : vector<16x1xf32>
    %370 = math.rsqrt %369 : vector<16x1xf32>
    %371 = vector.broadcast %370 : vector<16x1xf32> to vector<16x32xf32>
    %372 = arith.mulf %367, %371 : vector<16x32xf32>
    %373 = vector.broadcast %353 : vector<1x32xf32> to vector<16x32xf32>
    %374 = arith.mulf %372, %373 : vector<16x32xf32>
    %375 = vector.broadcast %354 : vector<1x32xf32> to vector<16x32xf32>
    %376 = arith.addf %374, %375 : vector<16x32xf32>
    %cst_120 = arith.constant dense<0.000000e+00> : vector<8x32xf32>
    %377 = tpu.matmul %35, %376, %cst_120 {dimension_numbers = #tpu.dot_dimension_numbers<[1], [0], [0], [1], [0, 0, 1, 1], [], []>} : vector<8x16xf32>, vector<16x32xf32>, vector<8x32xf32> -> vector<8x32xf32>
    %c352 = arith.constant 352 : index
    %c0_121 = arith.constant 0 : index
    %378 = vector.load %arg1[%c352, %c0_121] : memref<512x128xbf16, #tpu.memory_space<vmem>>, vector<32x64xbf16>
    %379 = arith.truncf %377 : vector<8x32xf32> to vector<8x32xbf16>
    %cst_122 = arith.constant dense<0.000000e+00> : vector<8x64xf32>
    %380 = tpu.matmul %379, %378, %cst_122 {dimension_numbers = #tpu.dot_dimension_numbers<[1], [0], [0], [1], [0, 0, 1, 1], [], []>} : vector<8x32xbf16>, vector<32x64xbf16>, vector<8x64xf32> -> vector<8x64xf32>
    %c32_123 = arith.constant 32 : index
    %c0_124 = arith.constant 0 : index
    %381 = vector.load %arg2[%c32_123, %c0_124] : memref<40x128xf32, #tpu.memory_space<vmem>>, vector<1x64xf32>
    %382 = vector.broadcast %381 : vector<1x64xf32> to vector<8x64xf32>
    %383 = arith.addf %380, %382 : vector<8x64xf32>
    %cst_125 = arith.constant 0.000000e+00 : f32
    %384 = vector.broadcast %cst_125 : f32 to vector<8x64xf32>
    %385 = arith.maximumf %383, %384 : vector<8x64xf32>
    %c384 = arith.constant 384 : index
    %c0_126 = arith.constant 0 : index
    %386 = vector.load %arg1[%c384, %c0_126] : memref<512x128xbf16, #tpu.memory_space<vmem>>, vector<64x64xbf16>
    %387 = arith.truncf %385 : vector<8x64xf32> to vector<8x64xbf16>
    %cst_127 = arith.constant dense<0.000000e+00> : vector<8x64xf32>
    %388 = tpu.matmul %387, %386, %cst_127 {dimension_numbers = #tpu.dot_dimension_numbers<[1], [0], [0], [1], [0, 0, 1, 1], [], []>} : vector<8x64xbf16>, vector<64x64xbf16>, vector<8x64xf32> -> vector<8x64xf32>
    %c33 = arith.constant 33 : index
    %c0_128 = arith.constant 0 : index
    %389 = vector.load %arg2[%c33, %c0_128] : memref<40x128xf32, #tpu.memory_space<vmem>>, vector<1x64xf32>
    %390 = vector.broadcast %389 : vector<1x64xf32> to vector<8x64xf32>
    %391 = arith.addf %388, %390 : vector<8x64xf32>
    %cst_129 = arith.constant 0.000000e+00 : f32
    %392 = vector.broadcast %cst_129 : f32 to vector<8x64xf32>
    %393 = arith.maximumf %391, %392 : vector<8x64xf32>
    %c448 = arith.constant 448 : index
    %c0_130 = arith.constant 0 : index
    %394 = vector.load %arg1[%c448, %c0_130] : memref<512x128xbf16, #tpu.memory_space<vmem>>, vector<64x128xbf16>
    %395 = arith.truncf %393 : vector<8x64xf32> to vector<8x64xbf16>
    %cst_131 = arith.constant dense<0.000000e+00> : vector<8x128xf32>
    %396 = tpu.matmul %395, %394, %cst_131 {dimension_numbers = #tpu.dot_dimension_numbers<[1], [0], [0], [1], [0, 0, 1, 1], [], []>} : vector<8x64xbf16>, vector<64x128xbf16>, vector<8x128xf32> -> vector<8x128xf32>
    %c34 = arith.constant 34 : index
    %c0_132 = arith.constant 0 : index
    %397 = vector.load %arg2[%c34, %c0_132] : memref<40x128xf32, #tpu.memory_space<vmem>>, vector<1x128xf32>
    %398 = vector.broadcast %397 : vector<1x128xf32> to vector<8x128xf32>
    %399 = arith.addf %396, %398 : vector<8x128xf32>
    %cst_133 = arith.constant 2.000000e+01 : f32
    %400 = vector.broadcast %cst_133 : f32 to vector<8x128xf32>
    %401 = arith.cmpf ogt, %399, %400 : vector<8x128xf32>
    %cst_134 = arith.constant 2.000000e+01 : f32
    %402 = vector.broadcast %cst_134 : f32 to vector<8x128xf32>
    %403 = arith.minimumf %399, %402 : vector<8x128xf32>
    %404 = math.exp %403 : vector<8x128xf32>
    %cst_135 = arith.constant 1.000000e+00 : f32
    %405 = vector.broadcast %cst_135 : f32 to vector<8x128xf32>
    %406 = arith.addf %405, %404 : vector<8x128xf32>
    %407 = math.log %406 : vector<8x128xf32>
    %408 = arith.select %401, %399, %407 : vector<8x128xi1>, vector<8x128xf32>
    %cst_136 = arith.constant 9.99999997E-7 : f32
    %409 = vector.broadcast %cst_136 : f32 to vector<8x128xf32>
    %410 = arith.addf %408, %409 : vector<8x128xf32>
    %411 = tpu.iota {dimensions = array<i32: 1>} : vector<8x128xi32>
    %c4_i32 = arith.constant 4 : i32
    %412 = vector.broadcast %c4_i32 : i32 to vector<8x128xi32>
    %413 = arith.cmpi slt, %411, %412 : vector<8x128xi32>
    %414 = arith.select %413, %399, %410 : vector<8x128xi1>, vector<8x128xf32>
    %c0_137 = arith.constant 0 : index
    %c0_138 = arith.constant 0 : index
    %415 = vector.load %arg3[%c0_137, %c0_138] : memref<8x128xf32, #tpu.memory_space<vmem>>, vector<8x128xf32>
    tpu.vector_store %arg3[%c0_137, %c0_138], %414 {strides = array<i32>} : memref<8x128xf32, #tpu.memory_space<vmem>>, vector<8x128xf32>,
    return
  }
}

</mosaic_0001>

<bundles_post_ra>
// kernel: actor_forward.1
= control target key start
LH: loop header
LB: loop body
LE: loop exit
PB: predicated region body
PF: predicated region fallthrough
CT: control target
= control target key end

     0   :  { %8 = vsyncpa [#allocation3], 0  ;;  %s3108_s12 = smov [#allocation2]   ;;  %s3628_s0 = inlined_call_operand.vmem [shape: f32[24,128], index: 0, kind: input, shape index: {}]   ;;  %s3629_s1 = inlined_call_operand.hbm [shape: bf16[512,128], index: 1, kind: input, shape index: {}]   ;;  %s3630_s2 = inlined_call_operand.vmem [shape: f32[40,128], index: 2, kind: input, shape index: {}]   ;;  %s3631_s3 = inlined_call_operand.vmem [shape: f32[8,128], index: 3, kind: output, shape index: {}]  }
   0x1   :  { %s16_s13 = sshll.u32 %s3108_s12, 4  ;;  %s3084_s16 = scalar_lea.hbm %s3629_s1, 4096  ;;  %s17_s13 = int_to_ptr.vmem [resolvable:$true] %s16_s13 }
   0x2   :  { %p3085_p0 = scmp.ne.s32.totalorder %s3629_s1, %s3084_s16  ;;  %p3088_p1 = scmp.lt.u32.totalorder %s3084_s16, %s3629_s1 }
   0x4   :  { %p3090_p2 = pnand %p3088_p1, %p3085_p0 }
   0x6   :  { %3093 = shalt.err (!%p3090_p2)
}
   0x7   :  { %s3094_s21 = scalar_lea.vmem %s17_s13, 4096  ;;  %p3099_p4 = scmp.lt.s32.totalorder %s17_s13, %s17_s13 }
   0x8   :  { %p3095_p3 = scmp.ne.s32.totalorder %s17_s13, %s3094_s21  ;;  %p3100_p5 = scmp.lt.s32.totalorder %s3094_s21, %s3094_s21 }
   0xa   :  { %p3101_p6 = por %p3100_p5, %p3099_p4 }
   0xc   :  { %p3102_p7 = pnand %p3101_p6, %p3095_p3 }
   0xe   :  { %3105 = shalt.err (!%p3102_p7)
}
   0xf   :  { %s3109_s22 = smov 64   ;;  %s3110_s23 = smov 4  }
  0x10   :  { %22 = dma.hbm_to_vmem [thread:$0]  %s3629_s1, 4096, %s17_s13, [#allocation3], %s3109_s22, %s3109_s22, %s3110_s23  }
  0x11   :  { %3106 = dma.done.wait [#allocation3], 4096  }
  0x12   :  { %3107 = vsyncadd [#allocation3], 4294963200  ;;  %v3111_v0 = vmov 0.0   ;;  %vm3112_vm0 = vmmov 0   ;;  %v2965_v1 = vld [vmem:[#allocation2] sm:$0xff]   ;;  %v2966_v2 = vld [vmem:[#allocation2 + $0x8] sm:$0xff]   ;;  %v34_v30 = vlaneseq }
  0x13   :  { %2683 = vmatprep.subr.bf16.mxu0 %v3111_v0  ;;  %2687 = vmatprep.mubr.msk.bf16.mxu0 %vm3112_vm0, %v3111_v0  ;;  %v29_v3 = vld [vmem:[%s3628_s0] sm:$0xff]  ;;  %v30_v4 = vld [vmem:[%s3628_s0 + $0x8] sm:$0xff]  ;;  %vm83_vm1 = vcmask 261120   ;;  %v2967_v6 = vld [vmem:[#allocation2 + $0x10] sm:$0xff]   ;;  %s3113_s8 = smov 120   ;;  %s3114_s9 = smov 96  }
  0x14   :  { %2691 = vmatprep.subr.bf16.mxu1 %v3111_v0  ;;  %2695 = vmatprep.mubr.msk.bf16.mxu1 %vm3112_vm0, %v3111_v0  ;;  %v68_v5 = vpack.c.bf16 %v30_v4, %v29_v3  ;;  %v2968_v7 = vld [vmem:[#allocation2 + $0x18] sm:$0xff]   ;;  %v69_v8 = vld [vmem:[%s3630_s2] sm:$0xff]  ;;  %v70_v10 = vld [vmem:[%s3630_s2 + $0x8] sm:$0xff]  ;;  %s3115_s10 = smov 88   ;;  %vm198_vm2 = vcmask 64512   ;;  %v3217_v32 = vshrl.u32 %v34_v30, 7 }
  0x15   :  { %2684 = vmatpush3.bf16.msra.mxu0 %v2965_v1  ;;  %2692 = vmatpush3.bf16.msra.mxu1 %v2967_v6  ;;  %v2503_v17 = vld [vmem:[%s3630_s2 + $0x10] ss:$0 sm:$0xff]  ;;  %v3219_v33 = vand.u32 127, %v34_v30  ;;  %vm57_vm6 = vcmask 130048   ;;  %s3116_s13 = smov 56   ;;  %s3117_s14 = smov 80  }
  0x16   :  { %2685 = vmatprep.subr.bf16.mxu0 %v3111_v0  ;;  %2693 = vmatprep.subr.bf16.mxu1 %v3111_v0  ;;  %v31_v31 = vld [vmem:[%s3628_s0 + $0x10] sm:$0x1]  ;;  %v36_v34 = vadd.s32 8, %v3217_v32  ;;  %v46_v35 = vsub.s32 0, %v3217_v32  ;;  %v37_v37 = vshra.s32 %v3217_v32, 3  ;;  %s3118_s15 = smov 112  }
  0x17   :  { %vm32_vm3 = vcmp.gt.f32.partialorder %v31_v31, 0.5  ;;  %v3226_v38 = vshra.s32 %v3219_v33, 3  ;;  %s3119_s16 = smov 72   ;;  %s3120_s17 = smov 48   ;;  %vm1069_vm7 = vcmask 523264   ;;  %vm2492_vm10 = vcmp.lt.s32.totalorder %v3219_v33, 4 }
  0x18   :  { %v33_v36 = vsel %vm32_vm3, -1e+30, %v3111_v0  ;;  %v38_v39 = vshra.s32 %v36_v34, 3  ;;  %s3121_s18 = smov 104   ;;  %s3122_s19 = smov 40  }
  0x19   :  { %2686 = vmatpush3.bf16.msra.mxu0 %v2966_v2  ;;  %2694 = vmatpush3.bf16.msra.mxu1 %v2968_v7  ;;  %v47_v40 = vrot.slane %v33_v36, %v46_v35  ;;  %vm42_vm4 = vcmp.eq.s32.totalorder %v37_v37, %v3226_v38  ;;  %vm55_vm8 = vcmp.eq.s32.totalorder %v3217_v32, %v3226_v38 }
  0x1a   :  { %2699 = vmatprep.subr.bf16.mxu0 %v3111_v0  ;;  %2705 = vmatprep.subr.bf16.mxu1 %v3111_v0  ;;  %vm43_vm5 = vcmp.eq.s32.totalorder %v38_v39, %v3226_v38 }
  0x1b   :  { %v3232_v41 = vsel %vm42_vm4, %v47_v40, -1e+30  ;;  %v3234_v43 = vsel %vm43_vm5, %v47_v40, -1e+30 }
  0x1c   :  { %2688 = vmatmul.mubr.msk.bf16.vlgmr.msra.gmra.mrb[0].mxu0 %vm83_vm1, %v68_v5 }
  0x1d   :  { %2701 = vmatprep.mubr.msk.bf16.mxu0 %vm3112_vm0, %v3111_v0 }
  0xef   :  { %v121_v9 = vpop.f32.mrb[0].mxu0 }
  0xf0   :  { %v2689_v11 = vpop.f32.mrb[1].mxu0  ;;  %v3183_v13 = vadd.f32 %v121_v9, %v69_v8 }
  0xf1   :  { %v124_v12 = vpop.f32.mrb[2].mxu0 }
  0xf2   :  { %v3185_v14 = vadd.f32 %v124_v12, %v70_v10  ;;  %v2690_v15 = vpop.f32.mrb[3].mxu0 }
  0xf4   :  { %v132_v16 = vpack.c.bf16 %v3185_v14, %v3183_v13 }
  0xf6   :  { %2696 = vmatmul.mubr.msk.bf16.vlgmr.msra.gmra.mrb[0].mxu1 %vm83_vm1, %v132_v16 }
  0xf7   :  { %2707 = vmatprep.mubr.msk.bf16.mxu1 %vm3112_vm0, %v3111_v0 }
 0x1c9   :  { %v187_v18 = vpop.f32.mrb[0].mxu1 }
 0x1ca   :  { %v2697_v19 = vpop.f32.mrb[1].mxu1  ;;  %v188_v21 = vadd.f32 %v2503_v17, %v187_v18  ;;  %v3250_v18 = vld [vmem:[#allocation2 + $0x20] sm:$0xff]  }
 0x1cb   :  { %v190_v20 = vpop.f32.mrb[2].mxu1  ;;  %v3254_v19 = vld [vmem:[#allocation2 + $0x28] sm:$0xff]  }
 0x1cc   :  { %v191_v22 = vadd.f32 %v2503_v17, %v190_v20  ;;  %v2698_v23 = vpop.f32.mrb[3].mxu1 }
 0x1ce   :  { %v3195_v24 = vpack.c.bf16 %v191_v22, %v188_v21 }
 0x1d0   :  { %321 = vrot.lane.b32.xlu1 %v3195_v24, %s3113_s8  ;;  %196 = vrot.lane.b32.xlu0 %v3195_v24, %s3114_s9 }
 0x1d4   :  { %323 = vrot.lane.b32.xlu0 %v3195_v24, %s3115_s10 }
 0x242   :  { %v197_v25 = vpop.permute.xlu0 %196  ;;  %v322_v29 = vpop.permute.xlu1 %321 }
 0x243   :  { %v203_v26 = vsel %vm198_vm2, %v197_v25, 0 }
 0x244   :  { %2700 = vmatpush3.bf16.xpose.msra.mxu0 %v203_v26 }
 0x245   :  { %2711 = vmatprep.subr.bf16.mxu0 %v3111_v0 }
 0x246   :  { %v324_v27 = vpop.permute.xlu0 %323 }
 0x247   :  { %v329_v28 = vsel %vm198_vm2, %v324_v27, 0 }
 0x24b   :  { %2702 = vmatmul.mubr.msk.bf16.vlgmr.msra.gmra.mrb[4].mxu0 %vm198_vm2, %v3195_v24 }
 0x24c   :  { %2712 = vmatpush3.bf16.xpose.msra.mxu0 %v329_v28  ;;  %2713 = vmatprep.mubr.msk.bf16.mxu0 %vm3112_vm0, %v3111_v0 }
 0x24d   :  { %2723 = vmatprep.subr.bf16.mxu0 %v3111_v0 }
 0x253   :  { %2714 = vmatmul.mubr.msk.bf16.vlgmr.msra.gmra.mrb[8].mxu0 %vm198_vm2, %v322_v29 }
 0x254   :  { %2727 = vmatprep.mubr.msk.bf16.mxu0 %vm3112_vm0, %v3111_v0 }
 0x31e   :  { %v239_v42 = vpop.f32.mrb[4].mxu0 }
 0x31f   :  { %v240_v44 = vadd.f32 %v239_v42, %v3232_v41  ;;  %v2703_v45 = vpop.f32.mrb[5].mxu0 }
 0x320   :  { %v242_v46 = vpop.f32.mrb[6].mxu0 }
 0x321   :  { %v243_v47 = vadd.f32 %v242_v46, %v3234_v43  ;;  %v2704_v48 = vpop.f32.mrb[7].mxu0  ;;  %v246_v49 = vsel %vm57_vm6, %v240_v44, -inf }
 0x322   :  { %247 = vmax.xlane.f32.xlu1 %v246_v49  ;;  %v514_v48 = vsel %vm198_vm2, %v3254_v19, 0 }
 0x323   :  { %v249_v50 = vsel %vm57_vm6, %v243_v47, -inf }
 0x324   :  { %250 = vmax.xlane.f32.xlu0 %v249_v50 }
 0x326   :  { %v365_v51 = vpop.f32.mrb[8].mxu0 }
 0x327   :  { %v366_v52 = vadd.f32 %v365_v51, %v3232_v41  ;;  %v2715_v53 = vpop.f32.mrb[9].mxu0 }
 0x328   :  { %v368_v54 = vpop.f32.mrb[10].mxu0 }
 0x329   :  { %v369_v55 = vadd.f32 %v368_v54, %v3234_v43  ;;  %v2716_v56 = vpop.f32.mrb[11].mxu0  ;;  %v372_v57 = vsel %vm57_vm6, %v366_v52, -inf }
 0x32a   :  { %373 = vmax.xlane.f32.xlu0 %v372_v57 }
 0x32b   :  { %v375_v58 = vsel %vm57_vm6, %v369_v55, -inf }
 0x32c   :  { %376 = vmax.xlane.f32.xlu1 %v375_v58 }
 0x3af   :  { %v248_v59 = vpop.xlane.xlu1 %247 }
 0x3b0   :  { %v252_v60 = vsub.f32 %v240_v44, %v248_v59 }
 0x3b1   :  { %v251_v61 = vpop.xlane.xlu0 %250 }
 0x3b2   :  { %v254_v62 = vmul.f32 1.442695, %v252_v60  ;;  %v253_v63 = vsub.f32 %v243_v47, %v251_v61  ;;  %v511_v47 = vsel %vm198_vm2, %v3250_v18, 0 }
 0x3b4   :  { %2997 = vpow2.f32 %v254_v62  ;;  %v256_v1 = vmul.f32 1.442695, %v253_v63 }
 0x3b6   :  { %2999 = vpow2.f32 %v256_v1 }
 0x3b7   :  { %v374_v2 = vpop.xlane.xlu0 %373 }
 0x3b8   :  { %v378_v3 = vsub.f32 %v366_v52, %v374_v2 }
 0x3b9   :  { %v377_v4 = vpop.xlane.xlu1 %376 }
 0x3ba   :  { %v380_v5 = vmul.f32 1.442695, %v378_v3  ;;  %v379_v6 = vsub.f32 %v369_v55, %v377_v4 }
 0x3bc   :  { %3001 = vpow2.f32 %v380_v5  ;;  %v382_v7 = vmul.f32 1.442695, %v379_v6 }
 0x3be   :  { %v2998_v8 = vpop.eup %2997  ;;  %3003 = vpow2.f32 %v382_v7 }
 0x3bf   :  { %v258_v9 = vsel %vm57_vm6, %v2998_v8, 0.0 }
 0x3c0   :  { %v3000_v10 = vpop.eup %2999  ;;  %259 = vadd.xlane.f32.xlu0 %v258_v9 }
 0x3c1   :  { %v261_v11 = vsel %vm57_vm6, %v3000_v10, 0.0 }
 0x3c2   :  { %262 = vadd.xlane.f32.xlu1 %v261_v11 }
 0x3c6   :  { %v3002_v12 = vpop.eup %3001 }
 0x3c7   :  { %v384_v15 = vsel %vm57_vm6, %v3002_v12, 0.0 }
 0x3c8   :  { %v3004_v16 = vpop.eup %3003  ;;  %385 = vadd.xlane.f32.xlu0 %v384_v15 }
 0x3c9   :  { %v387_v17 = vsel %vm57_vm6, %v3004_v16, 0.0 }
 0x3ca   :  { %388 = vadd.xlane.f32.xlu1 %v387_v17 }
 0x3db   :  { %395 = vrot.lane.b32.xlu1 %v3195_v24, %s3116_s13 }
 0x3de   :  { %269 = vrot.lane.b32.xlu0 %v3195_v24, %s3109_s22 }
 0x3df   :  { %453 = vrot.lane.b32.xlu1 %v3250_v18, %s3113_s8 }
 0x3e2   :  { %455 = vrot.lane.b32.xlu0 %v3254_v19, %s3113_s8 }
 0x3e3   :  { %559 = vrot.lane.b32.xlu1 %v3195_v24, %s3117_s14 }
 0x3e6   :  { %557 = vrot.lane.b32.xlu0 %v3195_v24, %s3118_s15 }
 0x44d   :  { %v260_v20 = vpop.xlane.xlu0 %259 }
 0x44e   :  { %3005 = vrcp.f32 %v260_v20 }
 0x44f   :  { %v263_v21 = vpop.xlane.xlu1 %262 }
 0x450   :  { %3007 = vrcp.f32 %v263_v21 }
 0x455   :  { %v386_v22 = vpop.xlane.xlu0 %385 }
 0x456   :  { %3009 = vrcp.f32 %v386_v22 }
 0x457   :  { %v389_v23 = vpop.xlane.xlu1 %388 }
 0x458   :  { %v3006_v25 = vpop.eup %3005  ;;  %3011 = vrcp.f32 %v389_v23 }
 0x459   :  { %v270_v26 = vpop.permute.xlu0 %269  ;;  %v266_v28 = vmul.f32 %v3006_v25, %v2998_v8 }
 0x45a   :  { %v3008_v27 = vpop.eup %3007  ;;  %2706 = vmatpush3.bf16.msra.mxu1 %v270_v26 }
 0x45b   :  { %v267_v29 = vmul.f32 %v3008_v27, %v3000_v10  ;;  %v396_v30 = vpop.permute.xlu1 %395  ;;  %2717 = vmatprep.subr.bf16.mxu1 %v3111_v0 }
 0x45d   :  { %v268_v31 = vpack.c.bf16 %v267_v29, %v266_v28  ;;  %v456_v44 = vpop.permute.xlu0 %455 }
 0x45e   :  { %v464_v46 = vsel %vm198_vm2, %v456_v44, 0 }
 0x45f   :  { %2708 = vmatmul.mubr.msk.bf16.vlgmr.msra.gmra.mrb[4].mxu1 %vm57_vm6, %v268_v31  ;;  %v454_v34 = vpop.permute.xlu1 %453 }
 0x460   :  { %v3010_v36 = vpop.eup %3009  ;;  %2718 = vmatpush3.bf16.msra.mxu1 %v396_v30  ;;  %v461_v37 = vsel %vm198_vm2, %v454_v34, 0  ;;  %2719 = vmatprep.mubr.msk.bf16.mxu1 %vm3112_vm0, %v3111_v0 }
 0x461   :  { %2731 = vmatprep.subr.bf16.mxu1 %v3111_v0  ;;  %2724 = vmatpush3.bf16.xpose.msra.mxu0 %v461_v37  ;;  %v392_v40 = vmul.f32 %v3010_v36, %v3002_v12  ;;  %v558_v61 = vpop.permute.xlu0 %557 }
 0x462   :  { %v3012_v39 = vpop.eup %3011  ;;  %2725 = vmatprep.subr.bf16.mxu0 %v3111_v0 }
 0x463   :  { %v393_v42 = vmul.f32 %v3012_v39, %v3004_v16  ;;  %v560_v56 = vpop.permute.xlu1 %559 }
 0x464   :  { %v565_v60 = vsel %vm198_vm2, %v560_v56, 0 }
 0x465   :  { %v394_v45 = vpack.c.bf16 %v393_v42, %v392_v40 }
 0x467   :  { %2720 = vmatmul.mubr.msk.bf16.vlgmr.msra.gmra.mrb[8].mxu1 %vm57_vm6, %v394_v45 }
 0x468   :  { %2735 = vmatprep.mubr.msk.bf16.mxu1 %vm3112_vm0, %v3111_v0 }
 0x469   :  { %2732 = vmatpush3.bf16.xpose.msra.mxu1 %v511_v47  ;;  %2726 = vmatpush3.bf16.xpose.msra.mxu0 %v464_v46 }
 0x46a   :  { %2733 = vmatprep.subr.bf16.mxu1 %v3111_v0  ;;  %2739 = vmatprep.subr.bf16.mxu0 %v3111_v0 }
 0x471   :  { %2734 = vmatpush3.bf16.xpose.msra.mxu1 %v514_v48 }
 0x472   :  { %2745 = vmatprep.subr.bf16.mxu1 %v3111_v0 }
 0x532   :  { %v309_v49 = vpop.f32.mrb[4].mxu1 }
 0x533   :  { %v2709_v50 = vpop.f32.mrb[5].mxu1 }
 0x534   :  { %v312_v51 = vpop.f32.mrb[6].mxu1 }
 0x535   :  { %v320_v52 = vpack.c.bf16 %v312_v51, %v309_v49  ;;  %v2710_v53 = vpop.f32.mrb[7].mxu1 }
 0x537   :  { %2736 = vmatmul.mubr.msk.bf16.vlgmr.msra.gmra.mrb[12].mxu1 %vm198_vm2, %v320_v52 }
 0x538   :  { %2747 = vmatprep.mubr.msk.bf16.mxu1 %vm3112_vm0, %v3111_v0 }
 0x53a   :  { %v435_v54 = vpop.f32.mrb[8].mxu1 }
 0x53b   :  { %v2721_v55 = vpop.f32.mrb[9].mxu1 }
 0x53c   :  { %v438_v57 = vpop.f32.mrb[10].mxu1 }
 0x53d   :  { %v442_v58 = vpack.c.bf16 %v438_v57, %v435_v54  ;;  %v2722_v59 = vpop.f32.mrb[11].mxu1 }
 0x53f   :  { %2728 = vmatmul.mubr.msk.bf16.vlgmr.msra.gmra.mrb[12].mxu0 %vm198_vm2, %v442_v58 }
 0x540   :  { %2740 = vmatpush3.bf16.xpose.msra.mxu0 %v565_v60  ;;  %2741 = vmatprep.mubr.msk.bf16.mxu0 %vm3112_vm0, %v3111_v0 }
 0x541   :  { %2751 = vmatprep.subr.bf16.mxu0 %v3111_v0 }
 0x547   :  { %2742 = vmatmul.mubr.msk.bf16.vlgmr.msra.gmra.mrb[16].mxu0 %vm198_vm2, %v558_v61 }
 0x548   :  { %2755 = vmatprep.mubr.msk.bf16.mxu0 %vm3112_vm0, %v3111_v0 }
 0x60a   :  { %v550_v62 = vpop.f32.mrb[12].mxu1 }
 0x60b   :  { %v2737_v63 = vpop.f32.mrb[13].mxu1 }
 0x60c   :  { %v553_v1 = vpop.f32.mrb[14].mxu1 }
 0x60d   :  { %v2738_v2 = vpop.f32.mrb[15].mxu1 }
 0x612   :  { %v500_v3 = vpop.f32.mrb[12].mxu0 }
 0x613   :  { %v3293_v4 = vadd.f32 %v550_v62, %v500_v3  ;;  %v2729_v5 = vpop.f32.mrb[13].mxu0 }
 0x614   :  { %v503_v6 = vpop.f32.mrb[14].mxu0 }
 0x615   :  { %v3295_v7 = vadd.f32 %v553_v1, %v503_v6  ;;  %v2730_v8 = vpop.f32.mrb[15].mxu0 }
 0x61a   :  { %v601_v9 = vpop.f32.mrb[16].mxu0 }
 0x61b   :  { %v602_v10 = vadd.f32 %v601_v9, %v3232_v41  ;;  %v2743_v11 = vpop.f32.mrb[17].mxu0 }
 0x61c   :  { %v604_v12 = vpop.f32.mrb[18].mxu0 }
 0x61d   :  { %v605_v15 = vadd.f32 %v604_v12, %v3234_v43  ;;  %v2744_v16 = vpop.f32.mrb[19].mxu0  ;;  %v608_v17 = vsel %vm57_vm6, %v602_v10, -inf }
 0x61e   :  { %609 = vmax.xlane.f32.xlu1 %v608_v17 }
 0x61f   :  { %v611_v20 = vsel %vm57_vm6, %v605_v15, -inf }
 0x620   :  { %612 = vmax.xlane.f32.xlu0 %v611_v20 }
 0x6ab   :  { %v610_v21 = vpop.xlane.xlu1 %609 }
 0x6ac   :  { %v614_v22 = vsub.f32 %v602_v10, %v610_v21 }
 0x6ad   :  { %v613_v23 = vpop.xlane.xlu0 %612 }
 0x6ae   :  { %v616_v25 = vmul.f32 1.442695, %v614_v22  ;;  %v615_v26 = vsub.f32 %v605_v15, %v613_v23 }
 0x6b0   :  { %3013 = vpow2.f32 %v616_v25  ;;  %v618_v27 = vmul.f32 1.442695, %v615_v26 }
 0x6b2   :  { %3015 = vpow2.f32 %v618_v27 }
 0x6ba   :  { %v3014_v28 = vpop.eup %3013 }
 0x6bb   :  { %v620_v29 = vsel %vm57_vm6, %v3014_v28, 0.0 }
 0x6bc   :  { %v3016_v30 = vpop.eup %3015  ;;  %621 = vadd.xlane.f32.xlu0 %v620_v29 }
 0x6bd   :  { %v623_v31 = vsel %vm57_vm6, %v3016_v30, 0.0 }
 0x6be   :  { %624 = vadd.xlane.f32.xlu1 %v623_v31 }
 0x6cf   :  { %737 = vrot.lane.b32.xlu1 %v3195_v24, %s3119_s16 }
 0x6d2   :  { %631 = vrot.lane.b32.xlu0 %v3195_v24, %s3120_s17 }
 0x6d3   :  { %735 = vrot.lane.b32.xlu1 %v3195_v24, %s3121_s18 }
 0x749   :  { %v622_v34 = vpop.xlane.xlu0 %621 }
 0x74a   :  { %3017 = vrcp.f32 %v622_v34 }
 0x74b   :  { %v625_v36 = vpop.xlane.xlu1 %624 }
 0x74c   :  { %3019 = vrcp.f32 %v625_v36 }
 0x74d   :  { %v632_v37 = vpop.permute.xlu0 %631 }
 0x74e   :  { %2746 = vmatpush3.bf16.msra.mxu1 %v632_v37 }
 0x74f   :  { %2759 = vmatprep.subr.bf16.mxu1 %v3111_v0  ;;  %v738_v45 = vpop.permute.xlu1 %737 }
 0x750   :  { %v743_v47 = vsel %vm198_vm2, %v738_v45, 0 }
 0x753   :  { %v736_v48 = vpop.permute.xlu1 %735 }
 0x754   :  { %v3018_v39 = vpop.eup %3017 }
 0x755   :  { %v628_v42 = vmul.f32 %v3018_v39, %v3014_v28 }
 0x756   :  { %v3020_v40 = vpop.eup %3019 }
 0x757   :  { %v629_v44 = vmul.f32 %v3020_v40, %v3016_v30 }
 0x759   :  { %v630_v46 = vpack.c.bf16 %v629_v44, %v628_v42 }
 0x75b   :  { %2748 = vmatmul.mubr.msk.bf16.vlgmr.msra.gmra.mrb[16].mxu1 %vm57_vm6, %v630_v46 }
 0x75c   :  { %2760 = vmatpush3.bf16.xpose.msra.mxu1 %v743_v47  ;;  %2761 = vmatprep.mubr.msk.bf16.mxu1 %vm3112_vm0, %v3111_v0  ;;  %v2521_v47 = vld [vmem:[%s3630_s2 + $0x11] ss:$0 sm:$0xff] }
 0x75d   :  { %2765 = vmatprep.subr.bf16.mxu1 %v3111_v0 }
 0x763   :  { %2762 = vmatmul.mubr.msk.bf16.vlgmr.msra.gmra.mrb[20].mxu1 %vm198_vm2, %v736_v48 }
 0x764   :  { %2767 = vmatprep.mubr.msk.bf16.mxu1 %vm3112_vm0, %v3111_v0 }
 0x82e   :  { %v671_v49 = vpop.f32.mrb[16].mxu1 }
 0x82f   :  { %v2749_v50 = vpop.f32.mrb[17].mxu1 }
 0x830   :  { %v674_v51 = vpop.f32.mrb[18].mxu1 }
 0x831   :  { %v678_v52 = vpack.c.bf16 %v674_v51, %v671_v49  ;;  %v2750_v53 = vpop.f32.mrb[19].mxu1 }
 0x836   :  { %v779_v54 = vpop.f32.mrb[20].mxu1 }
 0x837   :  { %v780_v55 = vadd.f32 %v779_v54, %v3232_v41  ;;  %v2763_v56 = vpop.f32.mrb[21].mxu1 }
 0x838   :  { %v782_v57 = vpop.f32.mrb[22].mxu1 }
 0x839   :  { %v783_v58 = vadd.f32 %v782_v57, %v3234_v43  ;;  %v2764_v59 = vpop.f32.mrb[23].mxu1  ;;  %v786_v60 = vsel %vm57_vm6, %v780_v55, -inf }
 0x83a   :  { %787 = vmax.xlane.f32.xlu0 %v786_v60 }
 0x83b   :  { %v789_v61 = vsel %vm57_vm6, %v783_v58, -inf }
 0x83c   :  { %790 = vmax.xlane.f32.xlu1 %v789_v61 }
 0x84d   :  { %809 = vrot.lane.b32.xlu1 %v3195_v24, %s3122_s19 }
 0x851   :  { %681 = vrot.lane.b32.xlu1 %v3254_v19, %s3118_s15 }
 0x855   :  { %857 = vrot.lane.b32.xlu1 %v3250_v18, %s3121_s18 }
 0x8c7   :  { %v788_v62 = vpop.xlane.xlu0 %787 }
 0x8c8   :  { %v792_v63 = vsub.f32 %v780_v55, %v788_v62 }
 0x8c9   :  { %v791_v1 = vpop.xlane.xlu1 %790 }
 0x8ca   :  { %v794_v2 = vmul.f32 1.442695, %v792_v63  ;;  %v793_v3 = vsub.f32 %v783_v58, %v791_v1 }
 0x8cc   :  { %3021 = vpow2.f32 %v794_v2  ;;  %v796_v5 = vmul.f32 1.442695, %v793_v3  ;;  %v2971_v3 = vld [vmem:[#allocation2 + $0x30] sm:$0xff]  }
 0x8cd   :  { %v810_v6 = vpop.permute.xlu1 %809 }
 0x8ce   :  { %3023 = vpow2.f32 %v796_v5  ;;  %2766 = vmatpush3.bf16.msra.mxu1 %v810_v6 }
 0x8cf   :  { %2779 = vmatprep.subr.bf16.mxu1 %v3111_v0 }
 0x8d1   :  { %v682_v17 = vpop.permute.xlu1 %681 }
 0x8d2   :  { %v690_v22 = vsel %vm198_vm2, %v682_v17, 0 }
 0x8d6   :  { %v3022_v8 = vpop.eup %3021 }
 0x8d7   :  { %v798_v24 = vsel %vm57_vm6, %v3022_v8, 0.0 }
 0x8d8   :  { %v3024_v9 = vpop.eup %3023  ;;  %799 = vadd.xlane.f32.xlu0 %v798_v24 }
 0x8d9   :  { %v801_v10 = vsel %vm57_vm6, %v3024_v9, 0.0 }
 0x8dc   :  { %802 = vadd.xlane.f32.xlu0 %v801_v10 }
 0x8f2   :  { %679 = vrot.lane.b32.xlu0 %v3250_v18, %s3118_s15 }
 0x8f6   :  { %859 = vrot.lane.b32.xlu0 %v3254_v19, %s3121_s18  ;;  %v858_v19 = vpop.permute.xlu1 %857 }
 0x8f7   :  { %v865_v26 = vsel %vm198_vm2, %v858_v19, 0 }
 0x965   :  { %v800_v11 = vpop.xlane.xlu0 %799 }
 0x966   :  { %3025 = vrcp.f32 %v800_v11 }
 0x969   :  { %v803_v12 = vpop.xlane.xlu0 %802 }
 0x96a   :  { %3027 = vrcp.f32 %v803_v12  ;;  %v2522_v12 = vld [vmem:[%s3630_s2 + $0x12] ss:$0 sm:$0xff] }
 0x96d   :  { %v680_v15 = vpop.permute.xlu0 %679 }
 0x96e   :  { %v687_v16 = vsel %vm198_vm2, %v680_v15, 0 }
 0x96f   :  { %2752 = vmatpush3.bf16.xpose.msra.mxu0 %v687_v16 }
 0x970   :  { %2753 = vmatprep.subr.bf16.mxu0 %v3111_v0  ;;  %v3026_v20 = vpop.eup %3025 }
 0x971   :  { %v806_v23 = vmul.f32 %v3026_v20, %v3022_v8  ;;  %v860_v27 = vpop.permute.xlu0 %859 }
 0x972   :  { %v868_v28 = vsel %vm198_vm2, %v860_v27, 0  ;;  %v2975_v27 = vld [vmem:[#allocation2 + $0x50] sm:$0xff]  }
 0x974   :  { %v3028_v21 = vpop.eup %3027 }
 0x975   :  { %v807_v18 = vmul.f32 %v3028_v21, %v3024_v9  ;;  %v2523_v21 = vld [vmem:[%s3630_s2 + $0x13] ss:$0 sm:$0xff] }
 0x977   :  { %2754 = vmatpush3.bf16.xpose.msra.mxu0 %v690_v22  ;;  %v808_v25 = vpack.c.bf16 %v807_v18, %v806_v23 }
 0x978   :  { %2771 = vmatprep.subr.bf16.mxu0 %v3111_v0 }
 0x979   :  { %2768 = vmatmul.mubr.msk.bf16.vlgmr.msra.gmra.mrb[24].mxu1 %vm57_vm6, %v808_v25  ;;  %v2973_v25 = vld [vmem:[#allocation2 + $0x40] sm:$0xff]  }
 0x97a   :  { %2783 = vmatprep.mubr.msk.bf16.mxu1 %vm3112_vm0, %v3111_v0  ;;  %2780 = vmatpush3.bf16.msra.mxu1 %v2971_v3 }
 0x97b   :  { %2781 = vmatprep.subr.bf16.mxu1 %v3111_v0 }
 0x97e   :  { %2756 = vmatmul.mubr.msk.bf16.vlgmr.msra.gmra.mrb[20].mxu0 %vm198_vm2, %v678_v52 }
 0x97f   :  { %2772 = vmatpush3.bf16.xpose.msra.mxu0 %v865_v26  ;;  %2775 = vmatprep.mubr.msk.bf16.mxu0 %vm3112_vm0, %v3111_v0  ;;  %v2974_v26 = vld [vmem:[#allocation2 + $0x48] sm:$0xff]  }
 0x980   :  { %2773 = vmatprep.subr.bf16.mxu0 %v3111_v0 }
 0x987   :  { %2774 = vmatpush3.bf16.xpose.msra.mxu0 %v868_v28  ;;  %v2976_v28 = vld [vmem:[#allocation2 + $0x58] sm:$0xff]  }
 0x988   :  { %2799 = vmatprep.subr.bf16.mxu0 %v3111_v0 }
 0xa4c   :  { %v849_v29 = vpop.f32.mrb[24].mxu1 }
 0xa4d   :  { %v2769_v30 = vpop.f32.mrb[25].mxu1 }
 0xa4e   :  { %v852_v31 = vpop.f32.mrb[26].mxu1 }
 0xa4f   :  { %v856_v34 = vpack.c.bf16 %v852_v31, %v849_v29  ;;  %v2770_v36 = vpop.f32.mrb[27].mxu1  ;;  %v2524_v29 = vld [vmem:[%s3630_s2 + $0x14] ss:$0 sm:$0xff] }
 0xa51   :  { %v726_v37 = vpop.f32.mrb[20].mxu0  ;;  %2776 = vmatmul.mubr.msk.bf16.vlgmr.msra.gmra.mrb[24].mxu0 %vm198_vm2, %v856_v34 }
 0xa52   :  { %v733_v39 = vadd.f32 %v726_v37, %v3293_v4  ;;  %v2757_v40 = vpop.f32.mrb[21].mxu0  ;;  %2803 = vmatprep.mubr.msk.bf16.mxu0 %vm3112_vm0, %v3111_v0 }
 0xa53   :  { %v729_v42 = vpop.f32.mrb[22].mxu0 }
 0xa54   :  { %v734_v44 = vadd.f32 %v729_v42, %v3295_v7  ;;  %v2758_v45 = vpop.f32.mrb[23].mxu0 }
 0xa55   :  { %v2528_v45 = vld [vmem:[%s3630_s2 + $0x15] ss:$0 sm:$0xff] }
 0xb24   :  { %v904_v46 = vpop.f32.mrb[24].mxu0 }
 0xb25   :  { %v911_v48 = vadd.f32 %v904_v46, %v733_v39  ;;  %v2777_v49 = vpop.f32.mrb[25].mxu0 }
 0xb26   :  { %v907_v50 = vpop.f32.mrb[26].mxu0 }
 0xb27   :  { %v918_v51 = vadd.f32 %v2521_v47, %v911_v48  ;;  %v912_v52 = vadd.f32 %v907_v50, %v734_v44  ;;  %v2778_v53 = vpop.f32.mrb[27].mxu0 }
 0xb29   :  { %v919_v4 = vadd.f32 %v2521_v47, %v912_v52  ;;  %v920_v54 = vadd.f32 %v918_v51, %v3183_v13 }
 0xb2b   :  { %v924_v55 = vsel %vm83_vm1, %v920_v54, 0.0  ;;  %v921_v56 = vadd.f32 %v919_v4, %v3185_v14  ;;  %v2972_v14 = vld [vmem:[#allocation2 + $0x38] sm:$0xff]  }
 0xb2c   :  { %925 = vadd.xlane.f32.xlu1 %v924_v55  ;;  %2782 = vmatpush3.bf16.msra.mxu1 %v2972_v14 }
 0xb2d   :  { %v927_v7 = vsel %vm83_vm1, %v921_v56, 0.0  ;;  %2787 = vmatprep.subr.bf16.mxu1 %v3111_v0 }
 0xb2e   :  { %928 = vadd.xlane.f32.xlu0 %v927_v7 }
 0xbb9   :  { %v926_v57 = vpop.xlane.xlu1 %925 }
 0xbba   :  { %v931_v58 = vmul.f32 0.03125, %v926_v57 }
 0xbbb   :  { %v929_v59 = vpop.xlane.xlu0 %928 }
 0xbbc   :  { %v933_v60 = vsub.f32 %v920_v54, %v931_v58  ;;  %v932_v61 = vmul.f32 0.03125, %v929_v59 }
 0xbbe   :  { %v934_v62 = vsub.f32 %v921_v56, %v932_v61  ;;  %v935_v63 = vmul.f32 %v933_v60, %v933_v60 }
 0xbc0   :  { %v937_v1 = vsel %vm83_vm1, %v935_v63, 0.0  ;;  %v936_v2 = vmul.f32 %v934_v62, %v934_v62 }
 0xbc1   :  { %938 = vadd.xlane.f32.xlu0 %v937_v1  ;;  %v2977_v1 = vld [vmem:[#allocation2 + $0x60] sm:$0xff]  }
 0xbc2   :  { %v940_v13 = vsel %vm83_vm1, %v936_v2, 0.0  ;;  %2800 = vmatpush3.bf16.msra.mxu0 %v2977_v1  ;;  %v2978_v2 = vld [vmem:[#allocation2 + $0x68] sm:$0xff]  }
 0xbc3   :  { %941 = vadd.xlane.f32.xlu1 %v940_v13  ;;  %2801 = vmatprep.subr.bf16.mxu0 %v3111_v0 }
 0xbc6   :  { %2802 = vmatpush3.bf16.msra.mxu0 %v2978_v2 }
 0xbc7   :  { %2807 = vmatprep.subr.bf16.mxu0 %v3111_v0 }
 0xc4e   :  { %v939_v5 = vpop.xlane.xlu0 %938 }
 0xc4f   :  { %v943_v6 = vmul.f32 0.03125, %v939_v5 }
 0xc50   :  { %v942_v8 = vpop.xlane.xlu1 %941 }
 0xc51   :  { %v945_v24 = vadd.f32 1e-05, %v943_v6  ;;  %v944_v9 = vmul.f32 0.03125, %v942_v8 }
 0xc53   :  { %3029 = vrsqrt.f32 %v945_v24  ;;  %v946_v10 = vadd.f32 1e-05, %v944_v9  ;;  %v2534_v9 = vld [vmem:[%s3630_s2 + $0x16] ss:$0 sm:$0xff] }
 0xc55   :  { %3031 = vrsqrt.f32 %v946_v10 }
 0xc5d   :  { %v3030_v11 = vpop.eup %3029 }
 0xc5e   :  { %v949_v15 = vmul.f32 %v3030_v11, %v933_v60 }
 0xc5f   :  { %v3032_v16 = vpop.eup %3031 }
 0xc60   :  { %v955_v17 = vmul.f32 %v2522_v12, %v949_v15  ;;  %v950_v20 = vmul.f32 %v3032_v16, %v934_v62  ;;  %v2535_v16 = vld [vmem:[%s3630_s2 + $0x17] ss:$0 sm:$0xff] }
 0xc62   :  { %v956_v22 = vmul.f32 %v2522_v12, %v950_v20  ;;  %v961_v23 = vadd.f32 %v2523_v21, %v955_v17 }
 0xc64   :  { %v962_v18 = vadd.f32 %v2523_v21, %v956_v22 }
 0xc66   :  { %v967_v19 = vpack.c.bf16 %v962_v18, %v961_v23 }
 0xc68   :  { %2784 = vmatmul.mubr.msk.bf16.vlgmr.msra.gmra.mrb[28].mxu1 %vm83_vm1, %v967_v19 }
 0xc69   :  { %2788 = vmatpush3.bf16.msra.mxu1 %v2973_v25  ;;  %2795 = vmatprep.mubr.msk.bf16.mxu1 %vm3112_vm0, %v3111_v0 }
 0xc6a   :  { %2789 = vmatprep.subr.bf16.mxu1 %v3111_v0 }
 0xc6d   :  { %2790 = vmatpush3.bf16.msra.mxu1 %v2974_v26 }
 0xc6e   :  { %2791 = vmatprep.subr.bf16.mxu1 %v3111_v0 }
 0xc71   :  { %2792 = vmatpush3.bf16.msra.mxu1 %v2975_v27 }
 0xc72   :  { %2793 = vmatprep.subr.bf16.mxu1 %v3111_v0 }
 0xc75   :  { %2794 = vmatpush3.bf16.msra.mxu1 %v2976_v28 }
 0xc76   :  { %2813 = vmatprep.subr.bf16.mxu1 %v3111_v0 }
 0xd3b   :  { %v1022_v30 = vpop.f32.mrb[28].mxu1 }
 0xd3c   :  { %v1023_v31 = vadd.f32 %v2524_v29, %v1022_v30  ;;  %v2785_v34 = vpop.f32.mrb[29].mxu1 }
 0xd3d   :  { %v1025_v36 = vpop.f32.mrb[30].mxu1 }
 0xd3e   :  { %v1026_v37 = vadd.f32 %v2524_v29, %v1025_v36  ;;  %v2786_v39 = vpop.f32.mrb[31].mxu1  ;;  %v1029_v40 = vmax.f32 %v1023_v31, 0.0 }
 0xd40   :  { %v1030_v42 = vmax.f32 %v1026_v37, 0.0 }
 0xd42   :  { %v1039_v44 = vpack.c.bf16 %v1030_v42, %v1029_v40 }
 0xd44   :  { %2796 = vmatmul.mubr.msk.bf16.vlgmr.msra.gmra.mrb[32].mxu1 %vm1069_vm7, %v1039_v44 }
 0xd45   :  { %2815 = vmatprep.mubr.msk.bf16.mxu1 %vm3112_vm0, %v3111_v0 }
 0xe17   :  { %v1107_v46 = vpop.f32.mrb[32].mxu1 }
 0xe18   :  { %v1108_v47 = vadd.f32 %v2528_v45, %v1107_v46  ;;  %v2797_v48 = vpop.f32.mrb[33].mxu1 }
 0xe19   :  { %v1110_v49 = vpop.f32.mrb[34].mxu1 }
 0xe1a   :  { %v1111_v50 = vadd.f32 %v2528_v45, %v1110_v49  ;;  %v2798_v51 = vpop.f32.mrb[35].mxu1  ;;  %v1114_v52 = vadd.f32 %v1108_v47, %v961_v23  ;;  %v2536_v23 = vld [vmem:[%s3630_s2 + $0x18] ss:$0 sm:$0xff] }
 0xe1c   :  { %v1118_v53 = vsel %vm83_vm1, %v1114_v52, 0.0  ;;  %v1115_v4 = vadd.f32 %v1111_v50, %v962_v18 }
 0xe1d   :  { %1119 = vadd.xlane.f32.xlu0 %v1118_v53 }
 0xe1e   :  { %v1121_v54 = vsel %vm83_vm1, %v1115_v4, 0.0 }
 0xe1f   :  { %1122 = vadd.xlane.f32.xlu1 %v1121_v54 }
 0xeaa   :  { %v1120_v55 = vpop.xlane.xlu0 %1119 }
 0xeab   :  { %v1124_v56 = vmul.f32 0.03125, %v1120_v55 }
 0xeac   :  { %v1123_v7 = vpop.xlane.xlu1 %1122 }
 0xead   :  { %v1126_v57 = vsub.f32 %v1114_v52, %v1124_v56  ;;  %v1125_v58 = vmul.f32 0.03125, %v1123_v7 }
 0xeaf   :  { %v1127_v59 = vsub.f32 %v1115_v4, %v1125_v58  ;;  %v1128_v60 = vmul.f32 %v1126_v57, %v1126_v57 }
 0xeb1   :  { %v1130_v61 = vsel %vm83_vm1, %v1128_v60, 0.0  ;;  %v1129_v62 = vmul.f32 %v1127_v59, %v1127_v59 }
 0xeb2   :  { %1131 = vadd.xlane.f32.xlu0 %v1130_v61 }
 0xeb3   :  { %v1133_v63 = vsel %vm83_vm1, %v1129_v62, 0.0 }
 0xeb4   :  { %1134 = vadd.xlane.f32.xlu1 %v1133_v63 }
 0xf3f   :  { %v1132_v13 = vpop.xlane.xlu0 %1131 }
 0xf40   :  { %v1136_v3 = vmul.f32 0.03125, %v1132_v13 }
 0xf41   :  { %v1135_v14 = vpop.xlane.xlu1 %1134 }
 0xf42   :  { %v1138_v5 = vadd.f32 1e-05, %v1136_v3  ;;  %v1137_v6 = vmul.f32 0.03125, %v1135_v14 }
 0xf44   :  { %3033 = vrsqrt.f32 %v1138_v5  ;;  %v1139_v8 = vadd.f32 1e-05, %v1137_v6 }
 0xf46   :  { %3035 = vrsqrt.f32 %v1139_v8 }
 0xf4e   :  { %v3034_v24 = vpop.eup %3033 }
 0xf4f   :  { %v1142_v10 = vmul.f32 %v3034_v24, %v1126_v57 }
 0xf50   :  { %v3036_v11 = vpop.eup %3035 }
 0xf51   :  { %v1148_v12 = vmul.f32 %v2534_v9, %v1142_v10  ;;  %v1143_v15 = vmul.f32 %v3036_v11, %v1127_v59  ;;  %v3444_v11 = vld [vmem:[#allocation2 + $0x70] sm:$0xff]  }
 0xf53   :  { %v1149_v17 = vmul.f32 %v2534_v9, %v1143_v15  ;;  %v3399_v20 = vadd.f32 %v2535_v16, %v1148_v12  ;;  %v3448_v12 = vld [vmem:[#allocation2 + $0x78] sm:$0xff]  }
 0xf55   :  { %v3401_v21 = vadd.f32 %v2535_v16, %v1149_v17 }
 0xf57   :  { %v1160_v22 = vpack.c.bf16 %v3401_v21, %v3399_v20 }
 0xf59   :  { %2804 = vmatmul.mubr.msk.bf16.vlgmr.msra.gmra.mrb[28].mxu0 %vm83_vm1, %v1160_v22 }
 0xf5a   :  { %2809 = vmatprep.mubr.msk.bf16.mxu0 %vm3112_vm0, %v3111_v0 }
0x102c   :  { %v1215_v18 = vpop.f32.mrb[28].mxu0 }
0x102d   :  { %v2805_v25 = vpop.f32.mrb[29].mxu0  ;;  %v1216_v26 = vadd.f32 %v2536_v23, %v1215_v18 }
0x102e   :  { %v1218_v19 = vpop.f32.mrb[30].mxu0 }
0x102f   :  { %v1219_v27 = vadd.f32 %v2536_v23, %v1218_v19  ;;  %v2806_v28 = vpop.f32.mrb[31].mxu0 }
0x1031   :  { %v3411_v29 = vpack.c.bf16 %v1219_v27, %v1216_v26 }
0x1033   :  { %1350 = vrot.lane.b32.xlu1 %v3411_v29, %s3115_s10  ;;  %1224 = vrot.lane.b32.xlu0 %v3411_v29, %s3114_s9 }
0x1037   :  { %1348 = vrot.lane.b32.xlu1 %v3411_v29, %s3113_s8 }
0x10a5   :  { %v1225_v30 = vpop.permute.xlu0 %1224  ;;  %v1351_v34 = vpop.permute.xlu1 %1350 }
0x10a6   :  { %v1230_v31 = vsel %vm198_vm2, %v1225_v30, 0  ;;  %v1356_v36 = vsel %vm198_vm2, %v1351_v34, 0 }
0x10a7   :  { %2808 = vmatpush3.bf16.xpose.msra.mxu0 %v1230_v31 }
0x10a8   :  { %2819 = vmatprep.subr.bf16.mxu0 %v3111_v0 }
0x10a9   :  { %v1349_v37 = vpop.permute.xlu1 %1348 }
0x10ae   :  { %2810 = vmatmul.mubr.msk.bf16.vlgmr.msra.gmra.mrb[32].mxu0 %vm198_vm2, %v3411_v29 }
0x10af   :  { %2820 = vmatpush3.bf16.xpose.msra.mxu0 %v1356_v36  ;;  %2821 = vmatprep.mubr.msk.bf16.mxu0 %vm3112_vm0, %v3111_v0 }
0x10b0   :  { %2831 = vmatprep.subr.bf16.mxu0 %v3111_v0 }
0x10b6   :  { %2822 = vmatmul.mubr.msk.bf16.vlgmr.msra.gmra.mrb[36].mxu0 %vm198_vm2, %v1349_v37 }
0x10b7   :  { %2835 = vmatprep.mubr.msk.bf16.mxu0 %vm3112_vm0, %v3111_v0 }
0x1181   :  { %v1266_v39 = vpop.f32.mrb[32].mxu0 }
0x1182   :  { %v1267_v40 = vadd.f32 %v1266_v39, %v3232_v41  ;;  %v2811_v42 = vpop.f32.mrb[33].mxu0 }
0x1183   :  { %v1269_v44 = vpop.f32.mrb[34].mxu0 }
0x1184   :  { %v1270_v45 = vadd.f32 %v1269_v44, %v3234_v43  ;;  %v2812_v46 = vpop.f32.mrb[35].mxu0  ;;  %v1273_v47 = vsel %vm57_vm6, %v1267_v40, -inf }
0x1185   :  { %1274 = vmax.xlane.f32.xlu0 %v1273_v47  ;;  %v1541_v46 = vsel %vm198_vm2, %v3448_v12, 0 }
0x1186   :  { %v1276_v48 = vsel %vm57_vm6, %v1270_v45, -inf }
0x1187   :  { %1277 = vmax.xlane.f32.xlu1 %v1276_v48 }
0x1189   :  { %v1392_v49 = vpop.f32.mrb[36].mxu0 }
0x118a   :  { %v1393_v50 = vadd.f32 %v1392_v49, %v3232_v41  ;;  %v2823_v51 = vpop.f32.mrb[37].mxu0 }
0x118b   :  { %v1395_v52 = vpop.f32.mrb[38].mxu0 }
0x118c   :  { %v1396_v53 = vadd.f32 %v1395_v52, %v3234_v43  ;;  %v2824_v4 = vpop.f32.mrb[39].mxu0  ;;  %v1399_v54 = vsel %vm57_vm6, %v1393_v50, -inf }
0x118d   :  { %1400 = vmax.xlane.f32.xlu0 %v1399_v54 }
0x118e   :  { %v1402_v55 = vsel %vm57_vm6, %v1396_v53, -inf }
0x1191   :  { %1403 = vmax.xlane.f32.xlu0 %v1402_v55 }
0x1212   :  { %v1275_v56 = vpop.xlane.xlu0 %1274 }
0x1213   :  { %v1279_v7 = vsub.f32 %v1267_v40, %v1275_v56 }
0x1214   :  { %v1278_v57 = vpop.xlane.xlu1 %1277 }
0x1215   :  { %v1281_v58 = vmul.f32 1.442695, %v1279_v7  ;;  %v1280_v59 = vsub.f32 %v1270_v45, %v1278_v57  ;;  %v1538_v45 = vsel %vm198_vm2, %v3444_v11, 0 }
0x1217   :  { %3037 = vpow2.f32 %v1281_v58  ;;  %v1283_v60 = vmul.f32 1.442695, %v1280_v59 }
0x1219   :  { %3039 = vpow2.f32 %v1283_v60 }
0x121a   :  { %v1401_v61 = vpop.xlane.xlu0 %1400 }
0x121b   :  { %v1405_v62 = vsub.f32 %v1393_v50, %v1401_v61 }
0x121d   :  { %v1407_v63 = vmul.f32 1.442695, %v1405_v62 }
0x121e   :  { %v1404_v1 = vpop.xlane.xlu0 %1403 }
0x121f   :  { %3041 = vpow2.f32 %v1407_v63  ;;  %v1406_v2 = vsub.f32 %v1396_v53, %v1404_v1 }
0x1221   :  { %v3038_v13 = vpop.eup %3037  ;;  %v1409_v3 = vmul.f32 1.442695, %v1406_v2 }
0x1222   :  { %v1285_v14 = vsel %vm57_vm6, %v3038_v13, 0.0 }
0x1223   :  { %v3040_v5 = vpop.eup %3039  ;;  %3043 = vpow2.f32 %v1409_v3  ;;  %1286 = vadd.xlane.f32.xlu1 %v1285_v14 }
0x1224   :  { %v1288_v6 = vsel %vm57_vm6, %v3040_v5, 0.0 }
0x1225   :  { %1289 = vadd.xlane.f32.xlu0 %v1288_v6 }
0x1229   :  { %v3042_v8 = vpop.eup %3041 }
0x122a   :  { %v1411_v24 = vsel %vm57_vm6, %v3042_v8, 0.0 }
0x122b   :  { %1412 = vadd.xlane.f32.xlu1 %v1411_v24 }
0x122d   :  { %v3044_v9 = vpop.eup %3043 }
0x122e   :  { %v1414_v10 = vsel %vm57_vm6, %v3044_v9, 0.0 }
0x122f   :  { %1415 = vadd.xlane.f32.xlu0 %v1414_v10 }
0x123c   :  { %1296 = vrot.lane.b32.xlu1 %v3411_v29, %s3109_s22 }
0x1240   :  { %1480 = vrot.lane.b32.xlu1 %v3444_v11, %s3113_s8 }
0x1244   :  { %1482 = vrot.lane.b32.xlu1 %v3448_v12, %s3113_s8 }
0x1245   :  { %1422 = vrot.lane.b32.xlu0 %v3411_v29, %s3116_s13 }
0x1248   :  { %1584 = vrot.lane.b32.xlu1 %v3411_v29, %s3118_s15 }
0x1249   :  { %1586 = vrot.lane.b32.xlu0 %v3411_v29, %s3117_s14 }
0x12b0   :  { %v1287_v15 = vpop.xlane.xlu1 %1286 }
0x12b1   :  { %3045 = vrcp.f32 %v1287_v15 }
0x12b2   :  { %v1290_v16 = vpop.xlane.xlu0 %1289 }
0x12b3   :  { %3047 = vrcp.f32 %v1290_v16 }
0x12b8   :  { %v1413_v17 = vpop.xlane.xlu1 %1412 }
0x12b9   :  { %3049 = vrcp.f32 %v1413_v17 }
0x12bb   :  { %v3046_v22 = vpop.eup %3045 }
0x12bc   :  { %v1297_v23 = vpop.permute.xlu1 %1296  ;;  %v1416_v18 = vpop.xlane.xlu0 %1415  ;;  %v1293_v19 = vmul.f32 %v3046_v22, %v3038_v13 }
0x12bd   :  { %v3048_v25 = vpop.eup %3047  ;;  %3051 = vrcp.f32 %v1416_v18  ;;  %2814 = vmatpush3.bf16.msra.mxu1 %v1297_v23 }
0x12be   :  { %v1294_v26 = vmul.f32 %v3048_v25, %v3040_v5  ;;  %2825 = vmatprep.subr.bf16.mxu1 %v3111_v0 }
0x12c0   :  { %v1481_v27 = vpop.permute.xlu1 %1480  ;;  %v1423_v28 = vpop.permute.xlu0 %1422  ;;  %v1295_v30 = vpack.c.bf16 %v1294_v26, %v1293_v19 }
0x12c1   :  { %v1488_v31 = vsel %vm198_vm2, %v1481_v27, 0 }
0x12c2   :  { %2816 = vmatmul.mubr.msk.bf16.vlgmr.msra.gmra.mrb[36].mxu1 %vm57_vm6, %v1295_v30  ;;  %2832 = vmatpush3.bf16.xpose.msra.mxu0 %v1488_v31 }
0x12c3   :  { %2826 = vmatpush3.bf16.msra.mxu1 %v1423_v28  ;;  %2827 = vmatprep.mubr.msk.bf16.mxu1 %vm3112_vm0, %v3111_v0  ;;  %v3050_v34 = vpop.eup %3049 }
0x12c4   :  { %2839 = vmatprep.subr.bf16.mxu1 %v3111_v0  ;;  %2833 = vmatprep.subr.bf16.mxu0 %v3111_v0  ;;  %v1483_v36 = vpop.permute.xlu1 %1482  ;;  %v1419_v40 = vmul.f32 %v3050_v34, %v3042_v8  ;;  %v1587_v4 = vpop.permute.xlu0 %1586 }
0x12c5   :  { %v1491_v39 = vsel %vm198_vm2, %v1483_v36, 0  ;;  %v1592_v7 = vsel %vm198_vm2, %v1587_v4, 0 }
0x12c7   :  { %v3052_v37 = vpop.eup %3051 }
0x12c8   :  { %v1420_v42 = vmul.f32 %v3052_v37, %v3044_v9  ;;  %v1585_v57 = vpop.permute.xlu1 %1584 }
0x12ca   :  { %v1421_v44 = vpack.c.bf16 %v1420_v42, %v1419_v40  ;;  %2834 = vmatpush3.bf16.xpose.msra.mxu0 %v1491_v39 }
0x12cb   :  { %2847 = vmatprep.subr.bf16.mxu0 %v3111_v0 }
0x12cc   :  { %2828 = vmatmul.mubr.msk.bf16.vlgmr.msra.gmra.mrb[40].mxu1 %vm57_vm6, %v1421_v44 }
0x12cd   :  { %2840 = vmatpush3.bf16.xpose.msra.mxu1 %v1538_v45  ;;  %2843 = vmatprep.mubr.msk.bf16.mxu1 %vm3112_vm0, %v3111_v0 }
0x12ce   :  { %2841 = vmatprep.subr.bf16.mxu1 %v3111_v0 }
0x12d5   :  { %2842 = vmatpush3.bf16.xpose.msra.mxu1 %v1541_v46 }
0x12d6   :  { %2853 = vmatprep.subr.bf16.mxu1 %v3111_v0 }
0x1395   :  { %v1336_v47 = vpop.f32.mrb[36].mxu1 }
0x1396   :  { %v2817_v48 = vpop.f32.mrb[37].mxu1 }
0x1397   :  { %v1339_v49 = vpop.f32.mrb[38].mxu1 }
0x1398   :  { %v1347_v50 = vpack.c.bf16 %v1339_v49, %v1336_v47  ;;  %v2818_v51 = vpop.f32.mrb[39].mxu1 }
0x139a   :  { %2844 = vmatmul.mubr.msk.bf16.vlgmr.msra.gmra.mrb[44].mxu1 %vm198_vm2, %v1347_v50 }
0x139b   :  { %2855 = vmatprep.mubr.msk.bf16.mxu1 %vm3112_vm0, %v3111_v0 }
0x139f   :  { %v1462_v52 = vpop.f32.mrb[40].mxu1 }
0x13a0   :  { %v2829_v53 = vpop.f32.mrb[41].mxu1 }
0x13a1   :  { %v1465_v54 = vpop.f32.mrb[42].mxu1 }
0x13a2   :  { %v1469_v55 = vpack.c.bf16 %v1465_v54, %v1462_v52  ;;  %v2830_v56 = vpop.f32.mrb[43].mxu1 }
0x13a4   :  { %2836 = vmatmul.mubr.msk.bf16.vlgmr.msra.gmra.mrb[40].mxu0 %vm198_vm2, %v1469_v55 }
0x13a5   :  { %2848 = vmatpush3.bf16.xpose.msra.mxu0 %v1592_v7  ;;  %2849 = vmatprep.mubr.msk.bf16.mxu0 %vm3112_vm0, %v3111_v0 }
0x13a6   :  { %2859 = vmatprep.subr.bf16.mxu0 %v3111_v0 }
0x13ac   :  { %2850 = vmatmul.mubr.msk.bf16.vlgmr.msra.gmra.mrb[44].mxu0 %vm198_vm2, %v1585_v57 }
0x13ad   :  { %2863 = vmatprep.mubr.msk.bf16.mxu0 %vm3112_vm0, %v3111_v0 }
0x146d   :  { %v1577_v58 = vpop.f32.mrb[44].mxu1 }
0x146e   :  { %v2845_v59 = vpop.f32.mrb[45].mxu1 }
0x146f   :  { %v1580_v60 = vpop.f32.mrb[46].mxu1 }
0x1470   :  { %v2846_v61 = vpop.f32.mrb[47].mxu1 }
0x1477   :  { %v1527_v62 = vpop.f32.mrb[40].mxu0 }
0x1478   :  { %v3487_v63 = vadd.f32 %v1577_v58, %v1527_v62  ;;  %v2837_v1 = vpop.f32.mrb[41].mxu0 }
0x1479   :  { %v1530_v2 = vpop.f32.mrb[42].mxu0 }
0x147a   :  { %v3489_v13 = vadd.f32 %v1580_v60, %v1530_v2  ;;  %v2838_v3 = vpop.f32.mrb[43].mxu0 }
0x147f   :  { %v1628_v14 = vpop.f32.mrb[44].mxu0 }
0x1480   :  { %v1629_v5 = vadd.f32 %v1628_v14, %v3232_v41  ;;  %v2851_v6 = vpop.f32.mrb[45].mxu0 }
0x1481   :  { %v1631_v8 = vpop.f32.mrb[46].mxu0 }
0x1482   :  { %v1632_v24 = vadd.f32 %v1631_v8, %v3234_v43  ;;  %v2852_v9 = vpop.f32.mrb[47].mxu0  ;;  %v1635_v10 = vsel %vm57_vm6, %v1629_v5, -inf }
0x1483   :  { %1636 = vmax.xlane.f32.xlu0 %v1635_v10 }
0x1484   :  { %v1638_v15 = vsel %vm57_vm6, %v1632_v24, -inf }
0x1485   :  { %1639 = vmax.xlane.f32.xlu1 %v1638_v15 }
0x1496   :  { %1658 = vrot.lane.b32.xlu1 %v3411_v29, %s3120_s17 }
0x149a   :  { %1762 = vrot.lane.b32.xlu1 %v3411_v29, %s3121_s18 }
0x1510   :  { %v1637_v16 = vpop.xlane.xlu0 %1636 }
0x1511   :  { %v1641_v17 = vsub.f32 %v1629_v5, %v1637_v16 }
0x1512   :  { %v1640_v22 = vpop.xlane.xlu1 %1639 }
0x1513   :  { %v1643_v23 = vmul.f32 1.442695, %v1641_v17  ;;  %v1642_v18 = vsub.f32 %v1632_v24, %v1640_v22 }
0x1515   :  { %3053 = vpow2.f32 %v1643_v23  ;;  %v1645_v25 = vmul.f32 1.442695, %v1642_v18 }
0x1516   :  { %v1659_v19 = vpop.permute.xlu1 %1658 }
0x1517   :  { %3055 = vpow2.f32 %v1645_v25  ;;  %2854 = vmatpush3.bf16.msra.mxu1 %v1659_v19 }
0x1518   :  { %2867 = vmatprep.subr.bf16.mxu1 %v3111_v0 }
0x151a   :  { %v1763_v46 = vpop.permute.xlu1 %1762 }
0x151f   :  { %v3054_v26 = vpop.eup %3053 }
0x1520   :  { %v1647_v27 = vsel %vm57_vm6, %v3054_v26, 0.0 }
0x1521   :  { %v3056_v28 = vpop.eup %3055  ;;  %1648 = vadd.xlane.f32.xlu0 %v1647_v27 }
0x1522   :  { %v1650_v30 = vsel %vm57_vm6, %v3056_v28, 0.0 }
0x1525   :  { %1651 = vadd.xlane.f32.xlu0 %v1650_v30 }
0x153b   :  { %1764 = vrot.lane.b32.xlu0 %v3411_v29, %s3119_s16 }
0x15ae   :  { %v1649_v31 = vpop.xlane.xlu0 %1648 }
0x15af   :  { %3057 = vrcp.f32 %v1649_v31 }
0x15b2   :  { %v1652_v34 = vpop.xlane.xlu0 %1651 }
0x15b3   :  { %3059 = vrcp.f32 %v1652_v34 }
0x15b6   :  { %v1765_v42 = vpop.permute.xlu0 %1764 }
0x15b7   :  { %v1770_v45 = vsel %vm198_vm2, %v1765_v42, 0  ;;  %v2554_v42 = vld [vmem:[%s3630_s2 + $0x19] ss:$0 sm:$0xff] }
0x15b9   :  { %v3058_v36 = vpop.eup %3057 }
0x15ba   :  { %v1655_v39 = vmul.f32 %v3058_v36, %v3054_v26 }
0x15bd   :  { %v3060_v37 = vpop.eup %3059 }
0x15be   :  { %v1656_v40 = vmul.f32 %v3060_v37, %v3056_v28 }
0x15c0   :  { %v1657_v44 = vpack.c.bf16 %v1656_v40, %v1655_v39 }
0x15c2   :  { %2856 = vmatmul.mubr.msk.bf16.vlgmr.msra.gmra.mrb[48].mxu1 %vm57_vm6, %v1657_v44 }
0x15c3   :  { %2868 = vmatpush3.bf16.xpose.msra.mxu1 %v1770_v45  ;;  %2869 = vmatprep.mubr.msk.bf16.mxu1 %vm3112_vm0, %v3111_v0 }
0x15c4   :  { %2873 = vmatprep.subr.bf16.mxu1 %v3111_v0 }
0x15ca   :  { %2870 = vmatmul.mubr.msk.bf16.vlgmr.msra.gmra.mrb[52].mxu1 %vm198_vm2, %v1763_v46 }
0x15cb   :  { %2875 = vmatprep.mubr.msk.bf16.mxu1 %vm3112_vm0, %v3111_v0 }
0x1695   :  { %v1698_v47 = vpop.f32.mrb[48].mxu1 }
0x1696   :  { %v2857_v48 = vpop.f32.mrb[49].mxu1 }
0x1697   :  { %v1701_v49 = vpop.f32.mrb[50].mxu1 }
0x1698   :  { %v1705_v50 = vpack.c.bf16 %v1701_v49, %v1698_v47  ;;  %v2858_v51 = vpop.f32.mrb[51].mxu1 }
0x169d   :  { %v1806_v52 = vpop.f32.mrb[52].mxu1 }
0x169e   :  { %v1807_v53 = vadd.f32 %v1806_v52, %v3232_v41  ;;  %v2871_v4 = vpop.f32.mrb[53].mxu1 }
0x169f   :  { %v1809_v54 = vpop.f32.mrb[54].mxu1 }
0x16a0   :  { %v1810_v55 = vadd.f32 %v1809_v54, %v3234_v43  ;;  %v2872_v56 = vpop.f32.mrb[55].mxu1  ;;  %v1813_v7 = vsel %vm57_vm6, %v1807_v53, -inf }
0x16a1   :  { %1814 = vmax.xlane.f32.xlu1 %v1813_v7 }
0x16a2   :  { %v1816_v57 = vsel %vm57_vm6, %v1810_v55, -inf }
0x16a3   :  { %1817 = vmax.xlane.f32.xlu0 %v1816_v57 }
0x172e   :  { %v1815_v58 = vpop.xlane.xlu1 %1814 }
0x172f   :  { %v1819_v59 = vsub.f32 %v1807_v53, %v1815_v58 }
0x1730   :  { %v1818_v60 = vpop.xlane.xlu0 %1817 }
0x1731   :  { %v1821_v61 = vmul.f32 1.442695, %v1819_v59  ;;  %v1820_v62 = vsub.f32 %v1810_v55, %v1818_v60  ;;  %v2981_v60 = vld [vmem:[#allocation2 + $0x80] sm:$0xff]  }
0x1733   :  { %3061 = vpow2.f32 %v1821_v61  ;;  %v1823_v1 = vmul.f32 1.442695, %v1820_v62 }
0x1735   :  { %3063 = vpow2.f32 %v1823_v1 }
0x173d   :  { %v3062_v41 = vpop.eup %3061 }
0x173e   :  { %v1825_v2 = vsel %vm57_vm6, %v3062_v41, 0.0 }
0x173f   :  { %v3064_v3 = vpop.eup %3063  ;;  %1826 = vadd.xlane.f32.xlu0 %v1825_v2 }
0x1740   :  { %v1828_v43 = vsel %vm57_vm6, %v3064_v3, 0.0 }
0x1741   :  { %1829 = vadd.xlane.f32.xlu1 %v1828_v43 }
0x1752   :  { %1706 = vrot.lane.b32.xlu1 %v3444_v11, %s3118_s15 }
0x1755   :  { %1836 = vrot.lane.b32.xlu0 %v3411_v29, %s3122_s19 }
0x1756   :  { %1708 = vrot.lane.b32.xlu1 %v3448_v12, %s3118_s15 }
0x1759   :  { %1884 = vrot.lane.b32.xlu0 %v3444_v11, %s3121_s18 }
0x175a   :  { %1886 = vrot.lane.b32.xlu1 %v3448_v12, %s3121_s18 }
0x17cc   :  { %v1827_v14 = vpop.xlane.xlu0 %1826 }
0x17cd   :  { %3065 = vrcp.f32 %v1827_v14 }
0x17ce   :  { %v1830_v5 = vpop.xlane.xlu1 %1829 }
0x17cf   :  { %3067 = vrcp.f32 %v1830_v5  ;;  %v2555_v5 = vld [vmem:[%s3630_s2 + $0x1a] ss:$0 sm:$0xff] }
0x17d0   :  { %v1837_v6 = vpop.permute.xlu0 %1836 }
0x17d1   :  { %2874 = vmatpush3.bf16.msra.mxu1 %v1837_v6 }
0x17d2   :  { %v1707_v8 = vpop.permute.xlu1 %1706  ;;  %2887 = vmatprep.subr.bf16.mxu1 %v3111_v0 }
0x17d3   :  { %v1714_v29 = vsel %vm198_vm2, %v1707_v8, 0 }
0x17d4   :  { %2860 = vmatpush3.bf16.xpose.msra.mxu0 %v1714_v29  ;;  %v1885_v17 = vpop.permute.xlu0 %1884 }
0x17d5   :  { %2861 = vmatprep.subr.bf16.mxu0 %v3111_v0  ;;  %v1892_v22 = vsel %vm198_vm2, %v1885_v17, 0  ;;  %v2985_v17 = vld [vmem:[#allocation2 + $0xa0] sm:$0xff]  }
0x17d6   :  { %v1709_v24 = vpop.permute.xlu1 %1708 }
0x17d7   :  { %v3066_v9 = vpop.eup %3065  ;;  %v1717_v10 = vsel %vm198_vm2, %v1709_v24, 0  ;;  %v2556_v24 = vld [vmem:[%s3630_s2 + $0x1b] ss:$0 sm:$0xff] }
0x17d8   :  { %v1833_v12 = vmul.f32 %v3066_v9, %v3062_v41 }
0x17d9   :  { %v3068_v11 = vpop.eup %3067 }
0x17da   :  { %v1834_v15 = vmul.f32 %v3068_v11, %v3064_v3  ;;  %v1887_v23 = vpop.permute.xlu1 %1886 }
0x17db   :  { %v1895_v18 = vsel %vm198_vm2, %v1887_v23, 0  ;;  %v2557_v23 = vld [vmem:[%s3630_s2 + $0x1c] ss:$0 sm:$0xff] }
0x17dc   :  { %2862 = vmatpush3.bf16.xpose.msra.mxu0 %v1717_v10  ;;  %v1835_v16 = vpack.c.bf16 %v1834_v15, %v1833_v12  ;;  %v2983_v12 = vld [vmem:[#allocation2 + $0x90] sm:$0xff]  }
0x17dd   :  { %2879 = vmatprep.subr.bf16.mxu0 %v3111_v0 }
0x17de   :  { %2876 = vmatmul.mubr.msk.bf16.vlgmr.msra.gmra.mrb[56].mxu1 %vm57_vm6, %v1835_v16  ;;  %v2984_v16 = vld [vmem:[#allocation2 + $0x98] sm:$0xff]  }
0x17df   :  { %2891 = vmatprep.mubr.msk.bf16.mxu1 %vm3112_vm0, %v3111_v0  ;;  %2888 = vmatpush3.bf16.msra.mxu1 %v2981_v60  ;;  %v3123_v60 = vmov 0.0|0.0  }
0x17e0   :  { %2889 = vmatprep.subr.bf16.mxu1 %v3111_v0 }
0x17e3   :  { %2864 = vmatmul.mubr.msk.bf16.vlgmr.msra.gmra.mrb[48].mxu0 %vm198_vm2, %v1705_v50 }
0x17e4   :  { %2880 = vmatpush3.bf16.xpose.msra.mxu0 %v1892_v22  ;;  %2883 = vmatprep.mubr.msk.bf16.mxu0 %vm3112_vm0, %v3111_v0  ;;  %v2986_v22 = vld [vmem:[#allocation2 + $0xa8] sm:$0xff]  }
0x17e5   :  { %2881 = vmatprep.subr.bf16.mxu0 %v3111_v0 }
0x17ec   :  { %2882 = vmatpush3.bf16.xpose.msra.mxu0 %v1895_v18 }
0x17ed   :  { %2946 = vmatprep.subr.bf16.mxu0 %v3123_v60 }
0x18b1   :  { %v1876_v25 = vpop.f32.mrb[56].mxu1 }
0x18b2   :  { %v2877_v19 = vpop.f32.mrb[57].mxu1 }
0x18b3   :  { %v1879_v26 = vpop.f32.mrb[58].mxu1 }
0x18b4   :  { %v1883_v27 = vpack.c.bf16 %v1879_v26, %v1876_v25  ;;  %v2878_v28 = vpop.f32.mrb[59].mxu1 }
0x18b6   :  { %v1753_v30 = vpop.f32.mrb[48].mxu0  ;;  %2884 = vmatmul.mubr.msk.bf16.vlgmr.msra.gmra.mrb[52].mxu0 %vm198_vm2, %v1883_v27 }
0x18b7   :  { %v1760_v31 = vadd.f32 %v1753_v30, %v3487_v63  ;;  %v2865_v34 = vpop.f32.mrb[49].mxu0  ;;  %2911 = vmatprep.mubr.msk.f32.mxu0 %vm3112_vm0, %v3111_v0 }
0x18b8   :  { %v1756_v36 = vpop.f32.mrb[50].mxu0 }
0x18b9   :  { %v1761_v37 = vadd.f32 %v1756_v36, %v3489_v13  ;;  %v2866_v39 = vpop.f32.mrb[51].mxu0  ;;  %v2561_v36 = vld [vmem:[%s3630_s2 + $0x1d] ss:$0 sm:$0xff] }
0x1989   :  { %v1931_v40 = vpop.f32.mrb[52].mxu0 }
0x198a   :  { %v1938_v44 = vadd.f32 %v1931_v40, %v1760_v31  ;;  %v2885_v45 = vpop.f32.mrb[53].mxu0 }
0x198b   :  { %v1934_v46 = vpop.f32.mrb[54].mxu0 }
0x198c   :  { %v1945_v47 = vadd.f32 %v2554_v42, %v1938_v44  ;;  %v1939_v48 = vadd.f32 %v1934_v46, %v1761_v37  ;;  %v2886_v49 = vpop.f32.mrb[55].mxu0 }
0x198e   :  { %v1946_v63 = vadd.f32 %v2554_v42, %v1939_v48  ;;  %v1947_v50 = vadd.f32 %v1945_v47, %v3399_v20 }
0x1990   :  { %v1951_v51 = vsel %vm83_vm1, %v1947_v50, 0.0  ;;  %v1948_v52 = vadd.f32 %v1946_v63, %v3401_v21  ;;  %v2982_v21 = vld [vmem:[#allocation2 + $0x88] sm:$0xff]   ;;  %v3083_v63 = vld [vmem:[%s3628_s0 + $0x10] sm:$0x1] }
0x1991   :  { %1952 = vadd.xlane.f32.xlu0 %v1951_v51  ;;  %2890 = vmatpush3.bf16.msra.mxu1 %v2982_v21 }
0x1992   :  { %v1954_v13 = vsel %vm83_vm1, %v1948_v52, 0.0  ;;  %2895 = vmatprep.subr.bf16.mxu1 %v3111_v0 }
0x1993   :  { %1955 = vadd.xlane.f32.xlu1 %v1954_v13 }
0x1a1e   :  { %v1953_v53 = vpop.xlane.xlu0 %1952 }
0x1a1f   :  { %v1957_v4 = vmul.f32 0.03125, %v1953_v53 }
0x1a20   :  { %v1956_v54 = vpop.xlane.xlu1 %1955 }
0x1a21   :  { %v1959_v55 = vsub.f32 %v1947_v50, %v1957_v4  ;;  %v1958_v56 = vmul.f32 0.03125, %v1956_v54  ;;  %v50_v50 = vsub.f32 1.0, %v3083_v63 }
0x1a23   :  { %v1960_v7 = vsub.f32 %v1948_v52, %v1958_v56  ;;  %v1961_v57 = vmul.f32 %v1959_v55, %v1959_v55  ;;  %v54_v53 = vrot.slane %v50_v50, %v46_v35 }
0x1a25   :  { %v1963_v58 = vsel %vm83_vm1, %v1961_v57, 0.0  ;;  %v1962_v59 = vmul.f32 %v1960_v7, %v1960_v7 }
0x1a26   :  { %1964 = vadd.xlane.f32.xlu0 %v1963_v58 }
0x1a27   :  { %v1966_v20 = vsel %vm83_vm1, %v1962_v59, 0.0 }
0x1a2a   :  { %1967 = vadd.xlane.f32.xlu0 %v1966_v20 }
0x1ab3   :  { %v1965_v61 = vpop.xlane.xlu0 %1964 }
0x1ab4   :  { %v1969_v62 = vmul.f32 0.03125, %v1965_v61 }
0x1ab6   :  { %v1971_v1 = vadd.f32 1e-05, %v1969_v62 }
0x1ab7   :  { %v1968_v41 = vpop.xlane.xlu0 %1967 }
0x1ab8   :  { %3069 = vrsqrt.f32 %v1971_v1  ;;  %v1970_v2 = vmul.f32 0.03125, %v1968_v41 }
0x1aba   :  { %v1972_v3 = vadd.f32 1e-05, %v1970_v2 }
0x1abc   :  { %3071 = vrsqrt.f32 %v1972_v3  ;;  %v2567_v3 = vld [vmem:[%s3630_s2 + $0x1e] ss:$0 sm:$0xff] }
0x1ac2   :  { %v3070_v43 = vpop.eup %3069 }
0x1ac3   :  { %v1975_v14 = vmul.f32 %v3070_v43, %v1959_v55 }
0x1ac5   :  { %v1981_v8 = vmul.f32 %v2555_v5, %v1975_v14 }
0x1ac6   :  { %v3072_v6 = vpop.eup %3071 }
0x1ac7   :  { %v1976_v29 = vmul.f32 %v3072_v6, %v1960_v7  ;;  %v1987_v11 = vadd.f32 %v2556_v24, %v1981_v8  ;;  %v56_v7 = vsel %vm55_vm8, %v54_v53, 0.0  ;;  %v2568_v8 = vld [vmem:[%s3630_s2 + $0x1f] ss:$0 sm:$0xff] }
0x1ac8   :  { %v58_v20 = vsel %vm57_vm6, %v56_v7, 0.0 }
0x1ac9   :  { %v1982_v9 = vmul.f32 %v2555_v5, %v1976_v29 }
0x1acb   :  { %v1988_v10 = vadd.f32 %v2556_v24, %v1982_v9 }
0x1acd   :  { %v1993_v15 = vpack.c.bf16 %v1988_v10, %v1987_v11 }
0x1acf   :  { %2892 = vmatmul.mubr.msk.bf16.vlgmr.msra.gmra.mrb[60].mxu1 %vm83_vm1, %v1993_v15  ;;  %v2987_v15 = vld [vmem:[#allocation2 + $0xb0] sm:$0xff]  }
0x1ad0   :  { %2896 = vmatpush3.bf16.msra.mxu1 %v2983_v12  ;;  %2903 = vmatprep.mubr.msk.bf16.mxu1 %vm3112_vm0, %v3111_v0 }
0x1ad1   :  { %2897 = vmatprep.subr.bf16.mxu1 %v3111_v0 }
0x1ad4   :  { %2898 = vmatpush3.bf16.msra.mxu1 %v2984_v16  ;;  %v2988_v16 = vld [vmem:[#allocation2 + $0xb8] sm:$0xff]  }
0x1ad5   :  { %2899 = vmatprep.subr.bf16.mxu1 %v3111_v0 }
0x1ad8   :  { %2900 = vmatpush3.bf16.msra.mxu1 %v2985_v17  ;;  %v2989_v17 = vld [vmem:[#allocation2 + $0xc0] sm:$0xff]  }
0x1ad9   :  { %2901 = vmatprep.subr.bf16.mxu1 %v3111_v0 }
0x1adc   :  { %2902 = vmatpush3.bf16.msra.mxu1 %v2986_v22  ;;  %v2990_v22 = vld [vmem:[#allocation2 + $0xc8] sm:$0xff]  }
0x1add   :  { %2922 = vmatprep.subr.bf16.mxu1 %v3111_v0 }
0x1ba2   :  { %v2048_v18 = vpop.f32.mrb[60].mxu1 }
0x1ba3   :  { %v2049_v25 = vadd.f32 %v2557_v23, %v2048_v18  ;;  %v2893_v19 = vpop.f32.mrb[61].mxu1 }
0x1ba4   :  { %v2051_v26 = vpop.f32.mrb[62].mxu1  ;;  %v2991_v19 = vld [vmem:[#allocation2 + $0xd0] sm:$0xff]  }
0x1ba5   :  { %v2052_v27 = vadd.f32 %v2557_v23, %v2051_v26  ;;  %v2894_v28 = vpop.f32.mrb[63].mxu1  ;;  %v2055_v30 = vmax.f32 %v2049_v25, 0.0  ;;  %v2992_v26 = vld [vmem:[#allocation2 + $0xd8] sm:$0xff]  }
0x1ba6   :  { %v2994_v28 = vld [vmem:[#allocation2 + $0xe8] sm:$0xff]  }
0x1ba7   :  { %v2056_v31 = vmax.f32 %v2052_v27, 0.0  ;;  %v2993_v27 = vld [vmem:[#allocation2 + $0xe0] sm:$0xff]  }
0x1ba9   :  { %v2065_v34 = vpack.c.bf16 %v2056_v31, %v2055_v30  ;;  %v2570_v30 = vld [vmem:[%s3630_s2 + $0x20] ss:$0 sm:$0xff] }
0x1bab   :  { %2904 = vmatmul.mubr.msk.bf16.vlgmr.msra.gmra.mrb[64].mxu1 %vm1069_vm7, %v2065_v34 }
0x1bac   :  { %2930 = vmatprep.mubr.msk.bf16.mxu1 %vm3112_vm0, %v3111_v0  ;;  %2923 = vmatpush3.bf16.msra.mxu1 %v2989_v17 }
0x1bad   :  { %2924 = vmatprep.subr.bf16.mxu1 %v3111_v0 }
0x1bb0   :  { %2925 = vmatpush3.bf16.msra.mxu1 %v2990_v22 }
0x1bb1   :  { %2926 = vmatprep.subr.bf16.mxu1 %v3111_v0 }
0x1bb4   :  { %2927 = vmatpush3.bf16.msra.mxu1 %v2991_v19 }
0x1bb5   :  { %2928 = vmatprep.subr.bf16.mxu1 %v3111_v0 }
0x1bb8   :  { %2929 = vmatpush3.bf16.msra.mxu1 %v2992_v26 }
0x1c7e   :  { %v2132_v37 = vpop.f32.mrb[64].mxu1 }
0x1c7f   :  { %v2133_v39 = vadd.f32 %v2561_v36, %v2132_v37  ;;  %v2905_v40 = vpop.f32.mrb[65].mxu1 }
0x1c80   :  { %v2135_v42 = vpop.f32.mrb[66].mxu1 }
0x1c81   :  { %v2136_v44 = vadd.f32 %v2561_v36, %v2135_v42  ;;  %v2906_v45 = vpop.f32.mrb[67].mxu1  ;;  %v2139_v46 = vadd.f32 %v2133_v39, %v1987_v11 }
0x1c82   :  { %v2996_v45 = vld [vmem:[#allocation2 + $0xf8] sm:$0xff]  }
0x1c83   :  { %v2143_v47 = vsel %vm83_vm1, %v2139_v46, 0.0  ;;  %v2140_v48 = vadd.f32 %v2136_v44, %v1988_v10  ;;  %v2995_v44 = vld [vmem:[#allocation2 + $0xf0] sm:$0xff]  }
0x1c84   :  { %2144 = vadd.xlane.f32.xlu1 %v2143_v47 }
0x1c85   :  { %v2146_v49 = vsel %vm83_vm1, %v2140_v48, 0.0 }
0x1c86   :  { %2147 = vadd.xlane.f32.xlu0 %v2146_v49 }
0x1d11   :  { %v2145_v51 = vpop.xlane.xlu1 %2144 }
0x1d12   :  { %v2149_v52 = vmul.f32 0.03125, %v2145_v51 }
0x1d13   :  { %v2148_v13 = vpop.xlane.xlu0 %2147 }
0x1d14   :  { %v2151_v4 = vsub.f32 %v2139_v46, %v2149_v52  ;;  %v2150_v54 = vmul.f32 0.03125, %v2148_v13  ;;  %v2574_v46 = vld [vmem:[%s3630_s2 + $0x21] ss:$0 sm:$0xff]  ;;  %v2580_v13 = vld [vmem:[%s3630_s2 + $0x22] ss:$0 sm:$0xff] }
0x1d16   :  { %v2152_v55 = vsub.f32 %v2140_v48, %v2150_v54  ;;  %v2153_v56 = vmul.f32 %v2151_v4, %v2151_v4 }
0x1d18   :  { %v2155_v57 = vsel %vm83_vm1, %v2153_v56, 0.0  ;;  %v2154_v58 = vmul.f32 %v2152_v55, %v2152_v55 }
0x1d19   :  { %2156 = vadd.xlane.f32.xlu1 %v2155_v57 }
0x1d1a   :  { %v2158_v59 = vsel %vm83_vm1, %v2154_v58, 0.0 }
0x1d1b   :  { %2159 = vadd.xlane.f32.xlu0 %v2158_v59 }
0x1d1d   :  { %59 = vadd.xlane.f32.xlu1 %v58_v20 }
0x1da6   :  { %v2157_v35 = vpop.xlane.xlu1 %2156 }
0x1da7   :  { %v2161_v21 = vmul.f32 0.03125, %v2157_v35 }
0x1da8   :  { %v2160_v61 = vpop.xlane.xlu0 %2159 }
0x1da9   :  { %v2163_v62 = vadd.f32 1e-05, %v2161_v21  ;;  %v2162_v32 = vmul.f32 0.03125, %v2160_v61 }
0x1daa   :  { %v60_v1 = vpop.xlane.xlu1 %59 }
0x1dab   :  { %3073 = vrsqrt.f32 %v2163_v62  ;;  %v2164_v38 = vadd.f32 1e-05, %v2162_v32  ;;  %v61_v41 = vadd.f32 1e-06, %v60_v1 }
0x1dad   :  { %3075 = vrsqrt.f32 %v2164_v38 }
0x1dae   :  { %3077 = vrcp.f32 %v61_v41 }
0x1db5   :  { %v3074_v2 = vpop.eup %3073 }
0x1db6   :  { %v2167_v43 = vmul.f32 %v3074_v2, %v2151_v4 }
0x1db7   :  { %v3076_v14 = vpop.eup %3075 }
0x1db8   :  { %v2168_v5 = vmul.f32 %v3076_v14, %v2152_v55  ;;  %v2173_v6 = vmul.f32 %v2567_v3, %v2167_v43  ;;  %v3078_v24 = vpop.eup %3077 }
0x1db9   :  { %v63_v12 = vmul.f32 %v3078_v24, %v56_v7 }
0x1dba   :  { %v2174_v29 = vmul.f32 %v2567_v3, %v2168_v5  ;;  %v2179_v9 = vadd.f32 %v2568_v8, %v2173_v6 }
0x1dbc   :  { %v2180_v11 = vadd.f32 %v2568_v8, %v2174_v29 }
0x1dbe   :  { %v2947_v10 = vpack.c.bf16 %v2180_v11, %v2179_v9 }
0x1dc0   :  { %2948 = vmatpush3.bf16.msra.mxu0 %v2947_v10 }
0x1dc1   :  { %2914 = vmatprep.subr.bf16.mxu0 %v3111_v0 }
0x1dc3   :  { %2912 = vmatmul.mubr.msk.f32.vlgmr.msra.gmra.mrb[56].mxu0 %vm57_vm6, %v63_v12 }
0x1dc4   :  { %2915 = vmatpush3.bf16.msra.mxu0 %v2987_v15  ;;  %2918 = vmatprep.mubr.msk.bf16.mxu0 %vm3112_vm0, %v3111_v0 }
0x1dc5   :  { %2916 = vmatprep.subr.bf16.mxu0 %v3111_v0 }
0x1dc8   :  { %2917 = vmatpush3.bf16.msra.mxu0 %v2988_v16 }
0x1dc9   :  { %2934 = vmatprep.subr.bf16.mxu0 %v3111_v0 }
0x1e96   :  { %v2250_v23 = vpop.f32.mrb[56].mxu0 }
0x1e97   :  { %v2258_v18 = vpack.c.bf16 %v2250_v23, %v2250_v23  ;;  %v2913_v25 = vpop.f32.mrb[57].mxu0 }
0x1e99   :  { %2919 = vmatmul.mubr.msk.bf16.vlgmr.msra.gmra.mrb[60].mxu0 %vm83_vm1, %v2258_v18 }
0x1e9a   :  { %2942 = vmatprep.mubr.msk.bf16.mxu0 %vm3112_vm0, %v3111_v0  ;;  %2935 = vmatpush3.bf16.msra.mxu0 %v2993_v27 }
0x1e9b   :  { %2936 = vmatprep.subr.bf16.mxu0 %v3111_v0 }
0x1e9e   :  { %2937 = vmatpush3.bf16.msra.mxu0 %v2994_v28 }
0x1e9f   :  { %2938 = vmatprep.subr.bf16.mxu0 %v3111_v0 }
0x1ea2   :  { %2939 = vmatpush3.bf16.msra.mxu0 %v2995_v44 }
0x1ea3   :  { %2940 = vmatprep.subr.bf16.mxu0 %v3111_v0 }
0x1ea6   :  { %2941 = vmatpush3.bf16.msra.mxu0 %v2996_v45 }
0x1f6c   :  { %v2313_v31 = vpop.f32.mrb[60].mxu0 }
0x1f6d   :  { %v2314_v34 = vadd.f32 %v2570_v30, %v2313_v31  ;;  %v2920_v36 = vpop.f32.mrb[61].mxu0 }
0x1f6e   :  { %v2316_v37 = vpop.f32.mrb[62].mxu0 }
0x1f6f   :  { %v2319_v39 = vmax.f32 %v2314_v34, 0.0  ;;  %v2921_v40 = vpop.f32.mrb[63].mxu0 }
0x1f71   :  { %v2328_v42 = vpack.c.bf16 %v2319_v39, %v2319_v39 }
0x1f73   :  { %2931 = vmatmul.mubr.msk.bf16.vlgmr.msra.gmra.mrb[68].mxu1 %vm1069_vm7, %v2328_v42 }
0x2046   :  { %v2395_v47 = vpop.f32.mrb[68].mxu1 }
0x2047   :  { %v2396_v48 = vadd.f32 %v2574_v46, %v2395_v47  ;;  %v2932_v49 = vpop.f32.mrb[69].mxu1 }
0x2048   :  { %v2398_v63 = vpop.f32.mrb[70].mxu1 }
0x2049   :  { %v2401_v50 = vmax.f32 %v2396_v48, 0.0  ;;  %v2933_v51 = vpop.f32.mrb[71].mxu1 }
0x204b   :  { %v2410_v52 = vpack.c.bf16 %v2401_v50, %v2401_v50 }
0x204d   :  { %2943 = vmatmul.mubr.msk.bf16.vlgmr.msra.gmra.mrb[64].mxu0 %vm1069_vm7, %v2410_v52 }
0x2120   :  { %v2477_v0 = vpop.f32.mrb[64].mxu0 }
0x2121   :  { %v2478_v53 = vadd.f32 %v2580_v13, %v2477_v0  ;;  %v2944_v4 = vpop.f32.mrb[65].mxu0 }
0x2122   :  { %v2480_v54 = vpop.f32.mrb[66].mxu0 }
0x2123   :  { %v2484_v55 = vmin.f32 %v2478_v53, 20.0  ;;  %v2945_v56 = vpop.f32.mrb[67].mxu0  ;;  %vm2483_vm9 = vcmp.gt.f32.partialorder %v2478_v53, 20.0 }
0x2125   :  { %v2485_v7 = vmul.f32 1.442695, %v2484_v55 }
0x2127   :  { %3079 = vpow2.f32 %v2485_v7 }
0x2131   :  { %v3080_v57 = vpop.eup %3079 }
0x2132   :  { %v2487_v58 = vadd.f32 1.0, %v3080_v57 }
0x2134   :  { %3081 = vlog2.f32 %v2487_v58 }
0x213e   :  { %v3082_v59 = vpop.eup %3081 }
0x213f   :  { %v2489_v20 = vmul.f32 0.6931472, %v3082_v59 }
0x2141   :  { %v2490_v60 = vsel %vm2483_vm9, %v2478_v53, %v2489_v20 }
0x2142   :  { %v2491_v35 = vadd.f32 1e-06, %v2490_v60 }
0x2144   :  { %v2493_v21 = vsel %vm2492_vm10, %v2478_v53, %v2491_v35 }
0x2145   :  { %2494 = vst [vmem:[%s3631_s3] sm:$0xff] %v2493_v21 }
0x2146   :  { %2499 = vsyncpa [#allocation3], 1 }

</bundles_post_ra>
